<compile_context>
chip_gen: v7x
topology: tpu7x:2x2x1
jax: 0.10.0
libtpu: 0.0.40
codegen_flags: <defaults>
</compile_context>

<pallas_src>
import jax
import jax.numpy as jnp
from jax.experimental import pallas as pl
from jax.experimental.pallas import tpu as pltpu


# Static geometry implied by the module (fc1 expects 256 = 64 * 2 * 2 features):
#   input 14x14x2 -> conv1(3x3) -> 12x12x32 -> pool2 -> 6x6x32
#   -> conv2(3x3) -> 4x4x64 -> pool2 -> 2x2x64 -> flatten 256 -> fc1 -> fc2
H_IN, W_IN, C_IN = 14, 14, 2
C1, C2 = 32, 64
H1P, W1P = 6, 6            # spatial after conv1 + pool
H2P, W2P = 2, 2            # spatial after conv2 + pool
K1 = 3 * 3 * C_IN          # 18
K2 = 3 * 3 * C1            # 288
N_FEAT = C2 * H2P * W2P    # 256
PAD_ROWS = 16              # >= max row shift (2*W1P + 2 = 14), multiple of 8


# ----------------------------------------------------------------------------
# Fused Pallas kernel: conv1+pool+relu -> conv2+pool+relu -> flatten -> fc1 -> fc2
# ----------------------------------------------------------------------------
def net_fused_kernel(p1_ref, w1_ref, b1_ref, w2_ref, b2_ref,
                     wfc1_ref, bfc1_ref, wfc2_ref, bfc2_ref,
                     o_ref,
                     y1_ref, p2_ref, feat_ref):
    n = feat_ref.shape[0]          # batch
    m1 = n * H1P * W1P             # pooled conv1 pixels (rows of y1)

    # ---- conv1: single MXU matmul over all 4 pool-window offsets ----------------
    # p1 rows are ordered (pool_offset, n, oy, ox); K features are (dy, dx, ci).
    c1 = jnp.dot(p1_ref[...], w1_ref[...],
                 preferred_element_type=jnp.float32)            # (4*m1, 32)
    # 2x2 max-pool = max over the 4 row groups; bias hoisted out of the max.
    y1 = jnp.maximum(jnp.maximum(c1[0 * m1:1 * m1], c1[1 * m1:2 * m1]),
                     jnp.maximum(c1[2 * m1:3 * m1], c1[3 * m1:4 * m1]))
    y1 = jnp.maximum(y1 + b1_ref[...], 0.0)                     # (m1, 32) rows=(n,oy,ox)

    # Stash y1 (plus zeroed pad rows) in VMEM so conv2's im2col is plain row shifts.
    y1_ref[pl.ds(0, m1), :] = y1
    y1_ref[pl.ds(m1, PAD_ROWS), :] = jnp.zeros((PAD_ROWS, C1), jnp.float32)

    # ---- conv2 im2col fully in VMEM: 9 shifted row-slices -> (m1, 288) ----------
    # For row r = n*36 + h*6 + w (valid h,w < 4), row r + dy*6 + dx of y1 is
    # y1[n, h+dy, w+dx, :]; invalid rows only feed outputs we never read.
    for dy in range(3):
        for dx in range(3):
            off = dy * W1P + dx
            p2_ref[:, pl.ds((dy * 3 + dx) * C1, C1)] = y1_ref[pl.ds(off, m1), :]

    # ---- conv2: one MXU matmul; bias hoisted past the pool max ------------------
    c2 = jnp.dot(p2_ref[...], w2_ref[...],
                 preferred_element_type=jnp.float32)            # (m1, 64)

    # ---- 2x2 max-pool + bias + relu, writing flattened (H, W, C) features -------
    b2 = b2_ref[...]
    for img in range(n):
        for oy in range(H2P):
            for ox in range(W2P):
                base = img * (H1P * W1P) + (2 * oy) * W1P + 2 * ox
                pooled = jnp.maximum(
                    jnp.maximum(c2[base:base + 1], c2[base + 1:base + 2]),
                    jnp.maximum(c2[base + W1P:base + W1P + 1],
                                c2[base + W1P + 1:base + W1P + 2]))   # (1, 64)
                pooled = jnp.maximum(pooled + b2, 0.0)
                feat_ref[pl.ds(img, 1), pl.ds((oy * W2P + ox) * C2, C2)] = pooled

    # ---- fc1 -> relu -> fc2 ------------------------------------------------------
    h = jnp.dot(feat_ref[...], wfc1_ref[...], preferred_element_type=jnp.float32)
    h = jnp.maximum(h + bfc1_ref[...], 0.0)
    o_ref[...] = (jnp.dot(h, wfc2_ref[...], preferred_element_type=jnp.float32)
                  + bfc2_ref[...])


# ----------------------------------------------------------------------------
# XLA-side glue on the input only: NCHW -> NHWC + pool-grouped im2col for conv1
# ----------------------------------------------------------------------------
def _conv1_pooled_patches(x_nhwc, k=3):
    n, h, w, c = x_nhwc.shape
    ho, wo = h - k + 1, w - k + 1
    cols = jnp.concatenate(
        [x_nhwc[:, dy:dy + ho, dx:dx + wo, :] for dy in range(k) for dx in range(k)],
        axis=-1)                                   # (n, ho, wo, k*k*c), features (dy,dx,ci)
    hp, wp = ho // 2, wo // 2
    g = cols.reshape(n, hp, 2, wp, 2, k * k * c)
    g = g.transpose(2, 4, 0, 1, 3, 5)              # (py, px, n, oy, ox, K)
    return g.reshape(4 * n * hp * wp, k * k * c)   # rows: (pool_offset, n, oy, ox)


def net_forward(x_nchw, kp):
    n = x_nchw.shape[0]
    x = jnp.transpose(x_nchw, (0, 2, 3, 1))        # NCHW -> NHWC (input prep)
    p1 = _conv1_pooled_patches(x)                  # (4*n*36, 18)

    m1 = n * H1P * W1P
    nb_hidden = kp["wfc1"].shape[1]
    fused = pl.pallas_call(
        net_fused_kernel,
        out_shape=jax.ShapeDtypeStruct((n, 10), jnp.float32),
        in_specs=[pl.BlockSpec(memory_space=pltpu.MemorySpace.VMEM)] * 9,
        out_specs=pl.BlockSpec(memory_space=pltpu.MemorySpace.VMEM),
        scratch_shapes=[
            pltpu.VMEM((m1 + PAD_ROWS, C1), jnp.float32),  # y1, padded for row shifts
            pltpu.VMEM((m1, K2), jnp.float32),             # conv2 im2col patches
            pltpu.VMEM((n, N_FEAT), jnp.float32),          # flattened features
        ],
    )
    return fused(p1, kp["w1"], kp["b1"], kp["w2"], kp["b2"],
                 kp["wfc1"], kp["bfc1"], kp["wfc2"], kp["bfc2"])


# ----------------------------------------------------------------------------
# Parameters: PyTorch-layout init + one-time prep into kernel-ready layout
# ----------------------------------------------------------------------------
def init_params(nb_hidden, key):
    ks = jax.random.split(key, 8)
    scale = 0.05
    return {
        # conv weights stored HWIO: (kH, kW, Cin, Cout)
        "w1": scale * jax.random.normal(ks[0], (3, 3, C_IN, C1), jnp.float32),
        "b1": scale * jax.random.normal(ks[1], (1, C1), jnp.float32),
        "w2": scale * jax.random.normal(ks[2], (3, 3, C1, C2), jnp.float32),
        "b2": scale * jax.random.normal(ks[3], (1, C2), jnp.float32),
        # fc1 weight stored (in=256, out); rows in PyTorch's (C, H, W) flatten order
        "wfc1": scale * jax.random.normal(ks[4], (N_FEAT, nb_hidden), jnp.float32),
        "bfc1": scale * jax.random.normal(ks[5], (1, nb_hidden), jnp.float32),
        "wfc2": scale * jax.random.normal(ks[6], (nb_hidden, 10), jnp.float32),
        "bfc2": scale * jax.random.normal(ks[7], (1, 10), jnp.float32),
    }


def prepare_params(params):
    """One-time weight prep (outside the hot path):
    - reshape HWIO conv filters to (K, Cout) matmul operands,
    - permute fc1's 256 input rows from PyTorch's (C, H, W) flatten order to the
      kernel's (H, W, C) order so no runtime transpose is needed before fc1."""
    i = jnp.arange(N_FEAT)
    perm = (i % C2) * (H2P * W2P) + i // C2        # (H,W,C)-flat idx -> (C,H,W)-flat idx
    return {
        "w1": params["w1"].reshape(-1, C1),
        "b1": params["b1"],
        "w2": params["w2"].reshape(-1, C2),
        "b2": params["b2"],
        "wfc1": params["wfc1"][perm],
        "bfc1": params["bfc1"],
        "wfc2": params["wfc2"],
        "bfc2": params["bfc2"],
    }


if __name__ == "__main__":
    key = jax.random.PRNGKey(0)
    k_x, k_p = jax.random.split(key)

    nb_hidden = 32
    batch = 2
    # forward implies 14x14 spatial with 2 input channels:
    # ((14-2)/2 - 2)/2 = 2  ->  64 * 2 * 2 = 256 features into fc1
    x = jax.random.normal(k_x, (batch, C_IN, H_IN, W_IN), jnp.float32)  # NCHW input
    params = init_params(nb_hidden, k_p)
    kparams = jax.tree_util.tree_map(jnp.asarray, prepare_params(params))  # one-time prep

    out = jax.jit(net_forward)(x, kparams)
    out = jax.block_until_ready(out)

    assert out.shape == (batch, 10), out.shape
    assert out.dtype == jnp.float32
    print("KERNEL_OK")
</pallas_src>

<mosaic_0001>
module attributes {stable_mosaic.version = 11 : i64} {
  func.func @net_fused_kernel(%arg0: memref<288x18xf32, #tpu.memory_space<vmem>>, %arg1: memref<18x32xf32, #tpu.memory_space<vmem>>, %arg2: memref<1x32xf32, #tpu.memory_space<vmem>>, %arg3: memref<288x64xf32, #tpu.memory_space<vmem>>, %arg4: memref<1x64xf32, #tpu.memory_space<vmem>>, %arg5: memref<256x32xf32, #tpu.memory_space<vmem>>, %arg6: memref<1x32xf32, #tpu.memory_space<vmem>>, %arg7: memref<32x10xf32, #tpu.memory_space<vmem>>, %arg8: memref<1x10xf32, #tpu.memory_space<vmem>>, %arg9: memref<2x10xf32, #tpu.memory_space<vmem>>, %arg10: memref<88x32xf32, #tpu.memory_space<vmem>>, %arg11: memref<72x288xf32, #tpu.memory_space<vmem>>, %arg12: memref<2x256xf32, #tpu.memory_space<vmem>>) attributes {dimension_semantics = [], scalar_prefetch = 0 : i64, scratch_operands = 3 : i64, tpu.core_type = #tpu.core_type<tc>} {
    %c0 = arith.constant 0 : index
    %c0_0 = arith.constant 0 : index
    %0 = vector.load %arg0[%c0, %c0_0] : memref<288x18xf32, #tpu.memory_space<vmem>>, vector<288x18xf32>
    %c0_1 = arith.constant 0 : index
    %c0_2 = arith.constant 0 : index
    %1 = vector.load %arg1[%c0_1, %c0_2] : memref<18x32xf32, #tpu.memory_space<vmem>>, vector<18x32xf32>
    %cst = arith.constant dense<0.000000e+00> : vector<288x32xf32>
    %2 = tpu.matmul %0, %1, %cst {dimension_numbers = #tpu.dot_dimension_numbers<[1], [0], [0], [1], [0, 0, 1, 1], [], []>} : vector<288x18xf32>, vector<18x32xf32>, vector<288x32xf32> -> vector<288x32xf32>
    %3 = vector.extract_strided_slice %2 {offsets = [0, 0], sizes = [72, 32], strides = [1, 1]} : vector<288x32xf32> to vector<72x32xf32>
    %4 = vector.extract_strided_slice %2 {offsets = [72, 0], sizes = [72, 32], strides = [1, 1]} : vector<288x32xf32> to vector<72x32xf32>
    %5 = arith.maximumf %3, %4 : vector<72x32xf32>
    %6 = vector.extract_strided_slice %2 {offsets = [144, 0], sizes = [72, 32], strides = [1, 1]} : vector<288x32xf32> to vector<72x32xf32>
    %7 = vector.extract_strided_slice %2 {offsets = [216, 0], sizes = [72, 32], strides = [1, 1]} : vector<288x32xf32> to vector<72x32xf32>
    %8 = arith.maximumf %6, %7 : vector<72x32xf32>
    %9 = arith.maximumf %5, %8 : vector<72x32xf32>
    %c0_3 = arith.constant 0 : index
    %c0_4 = arith.constant 0 : index
    %10 = vector.load %arg2[%c0_3, %c0_4] : memref<1x32xf32, #tpu.memory_space<vmem>>, vector<1x32xf32>
    %11 = vector.broadcast %10 : vector<1x32xf32> to vector<72x32xf32>
    %12 = arith.addf %9, %11 : vector<72x32xf32>
    %cst_5 = arith.constant 0.000000e+00 : f32
    %13 = vector.broadcast %cst_5 : f32 to vector<72x32xf32>
    %14 = arith.maximumf %12, %13 : vector<72x32xf32>
    %c0_6 = arith.constant 0 : index
    %c0_7 = arith.constant 0 : index
    %15 = vector.load %arg10[%c0_6, %c0_7] : memref<88x32xf32, #tpu.memory_space<vmem>>, vector<72x32xf32>
    tpu.vector_store %arg10[%c0_6, %c0_7], %14 {strides = array<i32>} : memref<88x32xf32, #tpu.memory_space<vmem>>, vector<72x32xf32>,
    %cst_8 = arith.constant 0.000000e+00 : f32
    %16 = vector.broadcast %cst_8 : f32 to vector<16x32xf32>
    %c72 = arith.constant 72 : index
    %c0_9 = arith.constant 0 : index
    %17 = vector.load %arg10[%c72, %c0_9] : memref<88x32xf32, #tpu.memory_space<vmem>>, vector<16x32xf32>
    tpu.vector_store %arg10[%c72, %c0_9], %16 {strides = array<i32>} : memref<88x32xf32, #tpu.memory_space<vmem>>, vector<16x32xf32>,
    %c0_10 = arith.constant 0 : index
    %c0_11 = arith.constant 0 : index
    %18 = vector.load %arg10[%c0_10, %c0_11] : memref<88x32xf32, #tpu.memory_space<vmem>>, vector<72x32xf32>
    %c0_12 = arith.constant 0 : index
    %c0_13 = arith.constant 0 : index
    %19 = vector.load %arg11[%c0_12, %c0_13] : memref<72x288xf32, #tpu.memory_space<vmem>>, vector<72x32xf32>
    tpu.vector_store %arg11[%c0_12, %c0_13], %18 {strides = array<i32>} : memref<72x288xf32, #tpu.memory_space<vmem>>, vector<72x32xf32>,
    %c1 = arith.constant 1 : index
    %c0_14 = arith.constant 0 : index
    %20 = vector.load %arg10[%c1, %c0_14] : memref<88x32xf32, #tpu.memory_space<vmem>>, vector<72x32xf32>
    %c0_15 = arith.constant 0 : index
    %c32 = arith.constant 32 : index
    %21 = vector.load %arg11[%c0_15, %c32] : memref<72x288xf32, #tpu.memory_space<vmem>>, vector<72x32xf32>
    tpu.vector_store %arg11[%c0_15, %c32], %20 {strides = array<i32>} : memref<72x288xf32, #tpu.memory_space<vmem>>, vector<72x32xf32>,
    %c2 = arith.constant 2 : index
    %c0_16 = arith.constant 0 : index
    %22 = vector.load %arg10[%c2, %c0_16] : memref<88x32xf32, #tpu.memory_space<vmem>>, vector<72x32xf32>
    %c0_17 = arith.constant 0 : index
    %c64 = arith.constant 64 : index
    %23 = vector.load %arg11[%c0_17, %c64] : memref<72x288xf32, #tpu.memory_space<vmem>>, vector<72x32xf32>
    tpu.vector_store %arg11[%c0_17, %c64], %22 {strides = array<i32>} : memref<72x288xf32, #tpu.memory_space<vmem>>, vector<72x32xf32>,
    %c6 = arith.constant 6 : index
    %c0_18 = arith.constant 0 : index
    %24 = vector.load %arg10[%c6, %c0_18] : memref<88x32xf32, #tpu.memory_space<vmem>>, vector<72x32xf32>
    %c0_19 = arith.constant 0 : index
    %c96 = arith.constant 96 : index
    %25 = vector.load %arg11[%c0_19, %c96] : memref<72x288xf32, #tpu.memory_space<vmem>>, vector<72x32xf32>
    tpu.vector_store %arg11[%c0_19, %c96], %24 {strides = array<i32>} : memref<72x288xf32, #tpu.memory_space<vmem>>, vector<72x32xf32>,
    %c7 = arith.constant 7 : index
    %c0_20 = arith.constant 0 : index
    %26 = vector.load %arg10[%c7, %c0_20] : memref<88x32xf32, #tpu.memory_space<vmem>>, vector<72x32xf32>
    %c0_21 = arith.constant 0 : index
    %c128 = arith.constant 128 : index
    %27 = vector.load %arg11[%c0_21, %c128] : memref<72x288xf32, #tpu.memory_space<vmem>>, vector<72x32xf32>
    tpu.vector_store %arg11[%c0_21, %c128], %26 {strides = array<i32>} : memref<72x288xf32, #tpu.memory_space<vmem>>, vector<72x32xf32>,
    %c8 = arith.constant 8 : index
    %c0_22 = arith.constant 0 : index
    %28 = vector.load %arg10[%c8, %c0_22] : memref<88x32xf32, #tpu.memory_space<vmem>>, vector<72x32xf32>
    %c0_23 = arith.constant 0 : index
    %c160 = arith.constant 160 : index
    %29 = vector.load %arg11[%c0_23, %c160] : memref<72x288xf32, #tpu.memory_space<vmem>>, vector<72x32xf32>
    tpu.vector_store %arg11[%c0_23, %c160], %28 {strides = array<i32>} : memref<72x288xf32, #tpu.memory_space<vmem>>, vector<72x32xf32>,
    %c12 = arith.constant 12 : index
    %c0_24 = arith.constant 0 : index
    %30 = vector.load %arg10[%c12, %c0_24] : memref<88x32xf32, #tpu.memory_space<vmem>>, vector<72x32xf32>
    %c0_25 = arith.constant 0 : index
    %c192 = arith.constant 192 : index
    %31 = vector.load %arg11[%c0_25, %c192] : memref<72x288xf32, #tpu.memory_space<vmem>>, vector<72x32xf32>
    tpu.vector_store %arg11[%c0_25, %c192], %30 {strides = array<i32>} : memref<72x288xf32, #tpu.memory_space<vmem>>, vector<72x32xf32>,
    %c13 = arith.constant 13 : index
    %c0_26 = arith.constant 0 : index
    %32 = vector.load %arg10[%c13, %c0_26] : memref<88x32xf32, #tpu.memory_space<vmem>>, vector<72x32xf32>
    %c0_27 = arith.constant 0 : index
    %c224 = arith.constant 224 : index
    %33 = vector.load %arg11[%c0_27, %c224] : memref<72x288xf32, #tpu.memory_space<vmem>>, vector<72x32xf32>
    tpu.vector_store %arg11[%c0_27, %c224], %32 {strides = array<i32>} : memref<72x288xf32, #tpu.memory_space<vmem>>, vector<72x32xf32>,
    %c14 = arith.constant 14 : index
    %c0_28 = arith.constant 0 : index
    %34 = vector.load %arg10[%c14, %c0_28] : memref<88x32xf32, #tpu.memory_space<vmem>>, vector<72x32xf32>
    %c0_29 = arith.constant 0 : index
    %c256 = arith.constant 256 : index
    %35 = vector.load %arg11[%c0_29, %c256] : memref<72x288xf32, #tpu.memory_space<vmem>>, vector<72x32xf32>
    tpu.vector_store %arg11[%c0_29, %c256], %34 {strides = array<i32>} : memref<72x288xf32, #tpu.memory_space<vmem>>, vector<72x32xf32>,
    %c0_30 = arith.constant 0 : index
    %c0_31 = arith.constant 0 : index
    %36 = vector.load %arg11[%c0_30, %c0_31] : memref<72x288xf32, #tpu.memory_space<vmem>>, vector<72x288xf32>
    %c0_32 = arith.constant 0 : index
    %c0_33 = arith.constant 0 : index
    %37 = vector.load %arg3[%c0_32, %c0_33] : memref<288x64xf32, #tpu.memory_space<vmem>>, vector<288x64xf32>
    %cst_34 = arith.constant dense<0.000000e+00> : vector<72x64xf32>
    %38 = tpu.matmul %36, %37, %cst_34 {dimension_numbers = #tpu.dot_dimension_numbers<[1], [0], [0], [1], [0, 0, 1, 1], [], []>} : vector<72x288xf32>, vector<288x64xf32>, vector<72x64xf32> -> vector<72x64xf32>
    %c0_35 = arith.constant 0 : index
    %c0_36 = arith.constant 0 : index
    %39 = vector.load %arg4[%c0_35, %c0_36] : memref<1x64xf32, #tpu.memory_space<vmem>>, vector<1x64xf32>
    %40 = vector.extract_strided_slice %38 {offsets = [0, 0], sizes = [1, 64], strides = [1, 1]} : vector<72x64xf32> to vector<1x64xf32>
    %41 = vector.extract_strided_slice %38 {offsets = [1, 0], sizes = [1, 64], strides = [1, 1]} : vector<72x64xf32> to vector<1x64xf32>
    %42 = arith.maximumf %40, %41 : vector<1x64xf32>
    %43 = vector.extract_strided_slice %38 {offsets = [6, 0], sizes = [1, 64], strides = [1, 1]} : vector<72x64xf32> to vector<1x64xf32>
    %44 = vector.extract_strided_slice %38 {offsets = [7, 0], sizes = [1, 64], strides = [1, 1]} : vector<72x64xf32> to vector<1x64xf32>
    %45 = arith.maximumf %43, %44 : vector<1x64xf32>
    %46 = arith.maximumf %42, %45 : vector<1x64xf32>
    %47 = arith.addf %46, %39 : vector<1x64xf32>
    %cst_37 = arith.constant 0.000000e+00 : f32
    %48 = vector.broadcast %cst_37 : f32 to vector<1x64xf32>
    %49 = arith.maximumf %47, %48 : vector<1x64xf32>
    %c0_38 = arith.constant 0 : index
    %c0_39 = arith.constant 0 : index
    %50 = vector.load %arg12[%c0_38, %c0_39] : memref<2x256xf32, #tpu.memory_space<vmem>>, vector<1x64xf32>
    tpu.vector_store %arg12[%c0_38, %c0_39], %49 {strides = array<i32>} : memref<2x256xf32, #tpu.memory_space<vmem>>, vector<1x64xf32>,
    %51 = vector.extract_strided_slice %38 {offsets = [2, 0], sizes = [1, 64], strides = [1, 1]} : vector<72x64xf32> to vector<1x64xf32>
    %52 = vector.extract_strided_slice %38 {offsets = [3, 0], sizes = [1, 64], strides = [1, 1]} : vector<72x64xf32> to vector<1x64xf32>
    %53 = arith.maximumf %51, %52 : vector<1x64xf32>
    %54 = vector.extract_strided_slice %38 {offsets = [8, 0], sizes = [1, 64], strides = [1, 1]} : vector<72x64xf32> to vector<1x64xf32>
    %55 = vector.extract_strided_slice %38 {offsets = [9, 0], sizes = [1, 64], strides = [1, 1]} : vector<72x64xf32> to vector<1x64xf32>
    %56 = arith.maximumf %54, %55 : vector<1x64xf32>
    %57 = arith.maximumf %53, %56 : vector<1x64xf32>
    %58 = arith.addf %57, %39 : vector<1x64xf32>
    %cst_40 = arith.constant 0.000000e+00 : f32
    %59 = vector.broadcast %cst_40 : f32 to vector<1x64xf32>
    %60 = arith.maximumf %58, %59 : vector<1x64xf32>
    %c0_41 = arith.constant 0 : index
    %c64_42 = arith.constant 64 : index
    %61 = vector.load %arg12[%c0_41, %c64_42] : memref<2x256xf32, #tpu.memory_space<vmem>>, vector<1x64xf32>
    tpu.vector_store %arg12[%c0_41, %c64_42], %60 {strides = array<i32>} : memref<2x256xf32, #tpu.memory_space<vmem>>, vector<1x64xf32>,
    %62 = vector.extract_strided_slice %38 {offsets = [12, 0], sizes = [1, 64], strides = [1, 1]} : vector<72x64xf32> to vector<1x64xf32>
    %63 = vector.extract_strided_slice %38 {offsets = [13, 0], sizes = [1, 64], strides = [1, 1]} : vector<72x64xf32> to vector<1x64xf32>
    %64 = arith.maximumf %62, %63 : vector<1x64xf32>
    %65 = vector.extract_strided_slice %38 {offsets = [18, 0], sizes = [1, 64], strides = [1, 1]} : vector<72x64xf32> to vector<1x64xf32>
    %66 = vector.extract_strided_slice %38 {offsets = [19, 0], sizes = [1, 64], strides = [1, 1]} : vector<72x64xf32> to vector<1x64xf32>
    %67 = arith.maximumf %65, %66 : vector<1x64xf32>
    %68 = arith.maximumf %64, %67 : vector<1x64xf32>
    %69 = arith.addf %68, %39 : vector<1x64xf32>
    %cst_43 = arith.constant 0.000000e+00 : f32
    %70 = vector.broadcast %cst_43 : f32 to vector<1x64xf32>
    %71 = arith.maximumf %69, %70 : vector<1x64xf32>
    %c0_44 = arith.constant 0 : index
    %c128_45 = arith.constant 128 : index
    %72 = vector.load %arg12[%c0_44, %c128_45] : memref<2x256xf32, #tpu.memory_space<vmem>>, vector<1x64xf32>
    tpu.vector_store %arg12[%c0_44, %c128_45], %71 {strides = array<i32>} : memref<2x256xf32, #tpu.memory_space<vmem>>, vector<1x64xf32>,
    %73 = vector.extract_strided_slice %38 {offsets = [14, 0], sizes = [1, 64], strides = [1, 1]} : vector<72x64xf32> to vector<1x64xf32>
    %74 = vector.extract_strided_slice %38 {offsets = [15, 0], sizes = [1, 64], strides = [1, 1]} : vector<72x64xf32> to vector<1x64xf32>
    %75 = arith.maximumf %73, %74 : vector<1x64xf32>
    %76 = vector.extract_strided_slice %38 {offsets = [20, 0], sizes = [1, 64], strides = [1, 1]} : vector<72x64xf32> to vector<1x64xf32>
    %77 = vector.extract_strided_slice %38 {offsets = [21, 0], sizes = [1, 64], strides = [1, 1]} : vector<72x64xf32> to vector<1x64xf32>
    %78 = arith.maximumf %76, %77 : vector<1x64xf32>
    %79 = arith.maximumf %75, %78 : vector<1x64xf32>
    %80 = arith.addf %79, %39 : vector<1x64xf32>
    %cst_46 = arith.constant 0.000000e+00 : f32
    %81 = vector.broadcast %cst_46 : f32 to vector<1x64xf32>
    %82 = arith.maximumf %80, %81 : vector<1x64xf32>
    %c0_47 = arith.constant 0 : index
    %c192_48 = arith.constant 192 : index
    %83 = vector.load %arg12[%c0_47, %c192_48] : memref<2x256xf32, #tpu.memory_space<vmem>>, vector<1x64xf32>
    tpu.vector_store %arg12[%c0_47, %c192_48], %82 {strides = array<i32>} : memref<2x256xf32, #tpu.memory_space<vmem>>, vector<1x64xf32>,
    %84 = vector.extract_strided_slice %38 {offsets = [36, 0], sizes = [1, 64], strides = [1, 1]} : vector<72x64xf32> to vector<1x64xf32>
    %85 = vector.extract_strided_slice %38 {offsets = [37, 0], sizes = [1, 64], strides = [1, 1]} : vector<72x64xf32> to vector<1x64xf32>
    %86 = arith.maximumf %84, %85 : vector<1x64xf32>
    %87 = vector.extract_strided_slice %38 {offsets = [42, 0], sizes = [1, 64], strides = [1, 1]} : vector<72x64xf32> to vector<1x64xf32>
    %88 = vector.extract_strided_slice %38 {offsets = [43, 0], sizes = [1, 64], strides = [1, 1]} : vector<72x64xf32> to vector<1x64xf32>
    %89 = arith.maximumf %87, %88 : vector<1x64xf32>
    %90 = arith.maximumf %86, %89 : vector<1x64xf32>
    %91 = arith.addf %90, %39 : vector<1x64xf32>
    %cst_49 = arith.constant 0.000000e+00 : f32
    %92 = vector.broadcast %cst_49 : f32 to vector<1x64xf32>
    %93 = arith.maximumf %91, %92 : vector<1x64xf32>
    %c1_50 = arith.constant 1 : index
    %c0_51 = arith.constant 0 : index
    %94 = vector.load %arg12[%c1_50, %c0_51] : memref<2x256xf32, #tpu.memory_space<vmem>>, vector<1x64xf32>
    tpu.vector_store %arg12[%c1_50, %c0_51], %93 {strides = array<i32>} : memref<2x256xf32, #tpu.memory_space<vmem>>, vector<1x64xf32>,
    %95 = vector.extract_strided_slice %38 {offsets = [38, 0], sizes = [1, 64], strides = [1, 1]} : vector<72x64xf32> to vector<1x64xf32>
    %96 = vector.extract_strided_slice %38 {offsets = [39, 0], sizes = [1, 64], strides = [1, 1]} : vector<72x64xf32> to vector<1x64xf32>
    %97 = arith.maximumf %95, %96 : vector<1x64xf32>
    %98 = vector.extract_strided_slice %38 {offsets = [44, 0], sizes = [1, 64], strides = [1, 1]} : vector<72x64xf32> to vector<1x64xf32>
    %99 = vector.extract_strided_slice %38 {offsets = [45, 0], sizes = [1, 64], strides = [1, 1]} : vector<72x64xf32> to vector<1x64xf32>
    %100 = arith.maximumf %98, %99 : vector<1x64xf32>
    %101 = arith.maximumf %97, %100 : vector<1x64xf32>
    %102 = arith.addf %101, %39 : vector<1x64xf32>
    %cst_52 = arith.constant 0.000000e+00 : f32
    %103 = vector.broadcast %cst_52 : f32 to vector<1x64xf32>
    %104 = arith.maximumf %102, %103 : vector<1x64xf32>
    %c1_53 = arith.constant 1 : index
    %c64_54 = arith.constant 64 : index
    %105 = vector.load %arg12[%c1_53, %c64_54] : memref<2x256xf32, #tpu.memory_space<vmem>>, vector<1x64xf32>
    tpu.vector_store %arg12[%c1_53, %c64_54], %104 {strides = array<i32>} : memref<2x256xf32, #tpu.memory_space<vmem>>, vector<1x64xf32>,
    %106 = vector.extract_strided_slice %38 {offsets = [48, 0], sizes = [1, 64], strides = [1, 1]} : vector<72x64xf32> to vector<1x64xf32>
    %107 = vector.extract_strided_slice %38 {offsets = [49, 0], sizes = [1, 64], strides = [1, 1]} : vector<72x64xf32> to vector<1x64xf32>
    %108 = arith.maximumf %106, %107 : vector<1x64xf32>
    %109 = vector.extract_strided_slice %38 {offsets = [54, 0], sizes = [1, 64], strides = [1, 1]} : vector<72x64xf32> to vector<1x64xf32>
    %110 = vector.extract_strided_slice %38 {offsets = [55, 0], sizes = [1, 64], strides = [1, 1]} : vector<72x64xf32> to vector<1x64xf32>
    %111 = arith.maximumf %109, %110 : vector<1x64xf32>
    %112 = arith.maximumf %108, %111 : vector<1x64xf32>
    %113 = arith.addf %112, %39 : vector<1x64xf32>
    %cst_55 = arith.constant 0.000000e+00 : f32
    %114 = vector.broadcast %cst_55 : f32 to vector<1x64xf32>
    %115 = arith.maximumf %113, %114 : vector<1x64xf32>
    %c1_56 = arith.constant 1 : index
    %c128_57 = arith.constant 128 : index
    %116 = vector.load %arg12[%c1_56, %c128_57] : memref<2x256xf32, #tpu.memory_space<vmem>>, vector<1x64xf32>
    tpu.vector_store %arg12[%c1_56, %c128_57], %115 {strides = array<i32>} : memref<2x256xf32, #tpu.memory_space<vmem>>, vector<1x64xf32>,
    %117 = vector.extract_strided_slice %38 {offsets = [50, 0], sizes = [1, 64], strides = [1, 1]} : vector<72x64xf32> to vector<1x64xf32>
    %118 = vector.extract_strided_slice %38 {offsets = [51, 0], sizes = [1, 64], strides = [1, 1]} : vector<72x64xf32> to vector<1x64xf32>
    %119 = arith.maximumf %117, %118 : vector<1x64xf32>
    %120 = vector.extract_strided_slice %38 {offsets = [56, 0], sizes = [1, 64], strides = [1, 1]} : vector<72x64xf32> to vector<1x64xf32>
    %121 = vector.extract_strided_slice %38 {offsets = [57, 0], sizes = [1, 64], strides = [1, 1]} : vector<72x64xf32> to vector<1x64xf32>
    %122 = arith.maximumf %120, %121 : vector<1x64xf32>
    %123 = arith.maximumf %119, %122 : vector<1x64xf32>
    %124 = arith.addf %123, %39 : vector<1x64xf32>
    %cst_58 = arith.constant 0.000000e+00 : f32
    %125 = vector.broadcast %cst_58 : f32 to vector<1x64xf32>
    %126 = arith.maximumf %124, %125 : vector<1x64xf32>
    %c1_59 = arith.constant 1 : index
    %c192_60 = arith.constant 192 : index
    %127 = vector.load %arg12[%c1_59, %c192_60] : memref<2x256xf32, #tpu.memory_space<vmem>>, vector<1x64xf32>
    tpu.vector_store %arg12[%c1_59, %c192_60], %126 {strides = array<i32>} : memref<2x256xf32, #tpu.memory_space<vmem>>, vector<1x64xf32>,
    %c0_61 = arith.constant 0 : index
    %c0_62 = arith.constant 0 : index
    %128 = vector.load %arg12[%c0_61, %c0_62] : memref<2x256xf32, #tpu.memory_space<vmem>>, vector<2x256xf32>
    %c0_63 = arith.constant 0 : index
    %c0_64 = arith.constant 0 : index
    %129 = vector.load %arg5[%c0_63, %c0_64] : memref<256x32xf32, #tpu.memory_space<vmem>>, vector<256x32xf32>
    %cst_65 = arith.constant dense<0.000000e+00> : vector<2x32xf32>
    %130 = tpu.matmul %128, %129, %cst_65 {dimension_numbers = #tpu.dot_dimension_numbers<[1], [0], [0], [1], [0, 0, 1, 1], [], []>} : vector<2x256xf32>, vector<256x32xf32>, vector<2x32xf32> -> vector<2x32xf32>
    %c0_66 = arith.constant 0 : index
    %c0_67 = arith.constant 0 : index
    %131 = vector.load %arg6[%c0_66, %c0_67] : memref<1x32xf32, #tpu.memory_space<vmem>>, vector<1x32xf32>
    %132 = vector.broadcast %131 : vector<1x32xf32> to vector<2x32xf32>
    %133 = arith.addf %130, %132 : vector<2x32xf32>
    %cst_68 = arith.constant 0.000000e+00 : f32
    %134 = vector.broadcast %cst_68 : f32 to vector<2x32xf32>
    %135 = arith.maximumf %133, %134 : vector<2x32xf32>
    %c0_69 = arith.constant 0 : index
    %c0_70 = arith.constant 0 : index
    %136 = vector.load %arg7[%c0_69, %c0_70] : memref<32x10xf32, #tpu.memory_space<vmem>>, vector<32x10xf32>
    %cst_71 = arith.constant dense<0.000000e+00> : vector<2x10xf32>
    %137 = tpu.matmul %135, %136, %cst_71 {dimension_numbers = #tpu.dot_dimension_numbers<[1], [0], [0], [1], [0, 0, 1, 1], [], []>} : vector<2x32xf32>, vector<32x10xf32>, vector<2x10xf32> -> vector<2x10xf32>
    %c0_72 = arith.constant 0 : index
    %c0_73 = arith.constant 0 : index
    %138 = vector.load %arg8[%c0_72, %c0_73] : memref<1x10xf32, #tpu.memory_space<vmem>>, vector<1x10xf32>
    %139 = vector.broadcast %138 : vector<1x10xf32> to vector<2x10xf32>
    %140 = arith.addf %137, %139 : vector<2x10xf32>
    %c0_74 = arith.constant 0 : index
    %c0_75 = arith.constant 0 : index
    %141 = vector.load %arg9[%c0_74, %c0_75] : memref<2x10xf32, #tpu.memory_space<vmem>>, vector<2x10xf32>
    tpu.vector_store %arg9[%c0_74, %c0_75], %140 {strides = array<i32>} : memref<2x10xf32, #tpu.memory_space<vmem>>, vector<2x10xf32>,
    return
  }
}

</mosaic_0001>

<bundles_post_ra>
// kernel: net_forward.1
= control target key start
LH: loop header
LB: loop body
LE: loop exit
PB: predicated region body
PF: predicated region fallthrough
CT: control target
= control target key end

     0   :  { %vm72_vm0 = vcmask 146432   ;;  %vm181_vm1 = vcmask 1041408   ;;  %s2764_s0 = inlined_call_operand.vmem [shape: f32[288,18], index: 0, kind: input, shape index: {}]   ;;  %s2765_s1 = inlined_call_operand.vmem [shape: f32[18,32], index: 1, kind: input, shape index: {}]   ;;  %s2766_s2 = inlined_call_operand.vmem [shape: f32[1,32], index: 2, kind: input, shape index: {}]   ;;  %s2767_s3 = inlined_call_operand.vmem [shape: f32[288,64], index: 3, kind: input, shape index: {}]   ;;  %s2768_s4 = inlined_call_operand.vmem [shape: f32[1,64], index: 4, kind: input, shape index: {}]   ;;  %s2769_s5 = inlined_call_operand.vmem [shape: f32[256,32], index: 5, kind: input, shape index: {}]   ;;  %s2770_s6 = inlined_call_operand.vmem [shape: f32[1,32], index: 6, kind: input, shape index: {}]   ;;  %s2771_s7 = inlined_call_operand.vmem [shape: f32[32,10], index: 7, kind: input, shape index: {}]   ;;  %s2772_s8 = inlined_call_operand.vmem [shape: f32[1,10], index: 8, kind: input, shape index: {}]   ;;  %s2773_s9 = inlined_call_operand.hbm [shape: f32[2,10], index: 9, kind: output, shape index: {}]  }
   0x1   :  { %v69_v0 = vld [vmem:[%s2765_s1] sm:$0xff]  ;;  %v70_v1 = vld [vmem:[%s2765_s1 + $0x8] sm:$0xff]  ;;  %v71_v4 = vld [vmem:[%s2765_s1 + $0x10] sm:$0x3] }
   0x2   :  { %v1844_v2 = vpack.c.bf16 %v70_v1, %v69_v0  ;;  %v33_v3 = vld [vmem:[%s2764_s0] sm:$0xff]  ;;  %v34_v5 = vld [vmem:[%s2764_s0 + $0x8] sm:$0xff]  ;;  %v35_v6 = vld [vmem:[%s2764_s0 + $0x10] sm:$0xff] }
   0x3   :  { %1744 = vmatprep.mubr.msk.f32.mxu0 %vm72_vm0, %v33_v3  ;;  %v36_v7 = vld [vmem:[%s2764_s0 + $0x18] sm:$0xff]  ;;  %v37_v8 = vld [vmem:[%s2764_s0 + $0x20] sm:$0xff] }
   0x4   :  { %1845 = vmatprep.subr.bf16.mxu0 %v1844_v2 }
   0x5   :  { %1847 = vmatpush3.bf16.msra.mxu0 %v1844_v2 }
   0x6   :  { %1742 = vmatprep.subr.msk.mxu0 %vm181_vm1, %v71_v4 }
   0x9   :  { %1743 = vmatpush3.msk.msra.mxu0 %vm181_vm1, %v71_v4 }
   0xa   :  { %1745 = vmatmul.mubr.msk.f32.vlgmr.msra.gmra.mrb[0].mxu0 %vm72_vm0, %v34_v5 }
   0xb   :  { %1747 = vmatprep.mubr.msk.f32.mxu0 %vm72_vm0, %v35_v6 }
   0xe   :  { %1748 = vmatmul.mubr.msk.f32.gmra.mrb[2].mxu0 %vm72_vm0, %v36_v7 }
   0xf   :  { %14 = vsyncpa [#allocation6], 0  ;;  %1750 = vmatprep.mubr.msk.f32.mxu0 %vm72_vm0, %v37_v8  ;;  %v38_v9 = vld [vmem:[%s2764_s0 + $0x28] sm:$0xff]  ;;  %v39_v10 = vld [vmem:[%s2764_s0 + $0x30] sm:$0xff]  ;;  %vm482_vm2 = vcmask 261120   ;;  %v1956_v40 = vmov 0.0  }
  0x10   :  { %v40_v11 = vld [vmem:[%s2764_s0 + $0x38] sm:$0xff]  ;;  %v41_v12 = vld [vmem:[%s2764_s0 + $0x40] sm:$0xff]  ;;  %v42_v13 = vld [vmem:[%s2764_s0 + $0x48] sm:$0xff]  ;;  %492 = vst.msk [vmem:[#allocation2 + $0x48] sm:$0xff] %vm482_vm2, %v1956_v40  ;;  %s1957_s1 = smov 32   ;;  %s1958_s25 = smov 64  }
  0x11   :  { %v43_v14 = vld [vmem:[%s2764_s0 + $0x50] sm:$0xff]  ;;  %v44_v15 = vld [vmem:[%s2764_s0 + $0x58] sm:$0xff]  ;;  %v45_v16 = vld [vmem:[%s2764_s0 + $0x60] sm:$0xff]  ;;  %493 = vst.msk [vmem:[#allocation2 + $0x50] sm:$0xff] %vm482_vm2, %v1956_v40  ;;  %vm557_vm3 = vcmask 523520   ;;  %vm612_vm4 = vcmask 785920  }
  0x12   :  { %1751 = vmatmul.mubr.msk.f32.gmra.mrb[4].mxu0 %vm72_vm0, %v38_v9  ;;  %v46_v17 = vld [vmem:[%s2764_s0 + $0x68] sm:$0xff]  ;;  %v47_v18 = vld [vmem:[%s2764_s0 + $0x70] sm:$0xff]  ;;  %v48_v19 = vld [vmem:[%s2764_s0 + $0x78] sm:$0xff]  ;;  %vm667_vm5 = vcmask 1048320   ;;  %vm1961_vm6 = vmmov 0   ;;  %vm1192_vm7 = vcmask 516096  }
  0x13   :  { %1753 = vmatprep.mubr.msk.f32.mxu0 %vm72_vm0, %v39_v10  ;;  %v49_v20 = vld [vmem:[%s2764_s0 + $0x80] sm:$0xff]  ;;  %v50_v21 = vld [vmem:[%s2764_s0 + $0x88] sm:$0xff]  ;;  %v51_v22 = vld [vmem:[%s2764_s0 + $0x90] sm:$0xff]  ;;  %vm1222_vm8 = vcmask 1040896   ;;  %s1963_s27 = smov [#allocation5]   ;;  %vm1520_vm9 = vcmask 74752  }
  0x14   :  { %v52_v23 = vld [vmem:[%s2764_s0 + $0x98] sm:$0xff]  ;;  %v53_v24 = vld [vmem:[%s2764_s0 + $0xa0] sm:$0xff]  ;;  %v54_v25 = vld [vmem:[%s2764_s0 + $0xa8] sm:$0xff]  ;;  %s1528_s28 = sshll.u32 %s1963_s27, 4  ;;  %s1529_s28 = int_to_ptr.vmem [resolvable:$true] %s1528_s28 }
  0x15   :  { %v55_v26 = vld [vmem:[%s2764_s0 + $0xb0] sm:$0xff]  ;;  %v56_v27 = vld [vmem:[%s2764_s0 + $0xb8] sm:$0xff]  ;;  %v57_v28 = vld [vmem:[%s2764_s0 + $0xc0] sm:$0xff]  ;;  %p1937_p1 = scmp.lt.s32.totalorder %s1529_s28, %s1529_s28 }
  0x16   :  { %1754 = vmatmul.mubr.msk.f32.gmra.mrb[6].mxu0 %vm72_vm0, %v40_v11  ;;  %v58_v29 = vld [vmem:[%s2764_s0 + $0xc8] sm:$0xff]  ;;  %v59_v30 = vld [vmem:[%s2764_s0 + $0xd0] sm:$0xff]  ;;  %v60_v31 = vld [vmem:[%s2764_s0 + $0xd8] sm:$0xff] }
  0x17   :  { %1756 = vmatprep.mubr.msk.f32.mxu0 %vm72_vm0, %v41_v12  ;;  %v61_v32 = vld [vmem:[%s2764_s0 + $0xe0] sm:$0xff]  ;;  %v62_v33 = vld [vmem:[%s2764_s0 + $0xe8] sm:$0xff]  ;;  %v63_v34 = vld [vmem:[%s2764_s0 + $0xf0] sm:$0xff] }
  0x18   :  { %v64_v35 = vld [vmem:[%s2764_s0 + $0xf8] sm:$0xff]  ;;  %v65_v36 = vld [vmem:[%s2764_s0 + $0x100] sm:$0xff]  ;;  %v66_v37 = vld [vmem:[%s2764_s0 + $0x108] sm:$0xff] }
  0x19   :  { %v67_v38 = vld [vmem:[%s2764_s0 + $0x110] sm:$0xff]  ;;  %v68_v39 = vld [vmem:[%s2764_s0 + $0x118] sm:$0xff]  ;;  %v703_v41 = vld [vmem:[#allocation2 + $0x48] sm:$0xff] }
  0x1a   :  { %1757 = vmatmul.mubr.msk.f32.gmra.mrb[8].mxu0 %vm72_vm0, %v42_v13  ;;  %729 = vrot.lane.b32.xlu0 %v703_v41, %s1957_s1  ;;  %v918_v11 = vld [vmem:[%s2767_s3 + $0x80] sm:$0xff]  ;;  %v919_v12 = vld [vmem:[%s2767_s3 + $0x88] sm:$0xff] }
  0x1b   :  { %1759 = vmatprep.mubr.msk.f32.mxu0 %vm72_vm0, %v43_v14  ;;  %v1848_v13 = vpack.c.bf16 %v919_v12, %v918_v11  ;;  %v902_v14 = vld [vmem:[%s2767_s3] sm:$0xff] }
  0x1d   :  { %1849 = vmatprep.subr.bf16.mxu1 %v1848_v13 }
  0x1e   :  { %1760 = vmatmul.mubr.msk.f32.gmra.mrb[10].mxu0 %vm72_vm0, %v44_v15  ;;  %v903_v15 = vld [vmem:[%s2767_s3 + $0x8] sm:$0xff] }
  0x1f   :  { %1762 = vmatprep.mubr.msk.f32.mxu0 %vm72_vm0, %v45_v16 }
  0x22   :  { %1763 = vmatmul.mubr.msk.f32.gmra.mrb[12].mxu0 %vm72_vm0, %v46_v17  ;;  %v1850_v17 = vpack.c.bf16 %v903_v15, %v902_v14 }
  0x23   :  { %1765 = vmatprep.mubr.msk.f32.mxu0 %vm72_vm0, %v47_v18 }
  0x24   :  { %1851 = vmatpush3.bf16.msra.mxu1 %v1850_v17 }
  0x26   :  { %1766 = vmatmul.mubr.msk.f32.gmra.mrb[14].mxu0 %vm72_vm0, %v48_v19  ;;  %v920_v19 = vld [vmem:[%s2767_s3 + $0x90] sm:$0xff] }
  0x27   :  { %1768 = vmatprep.mubr.msk.f32.mxu0 %vm72_vm0, %v49_v20  ;;  %v921_v20 = vld [vmem:[%s2767_s3 + $0x98] sm:$0xff] }
  0x2a   :  { %1769 = vmatmul.mubr.msk.f32.gmra.mrb[16].mxu0 %vm72_vm0, %v50_v21  ;;  %v904_v21 = vld [vmem:[%s2767_s3 + $0x10] sm:$0xff] }
  0x2b   :  { %1771 = vmatprep.mubr.msk.f32.mxu0 %vm72_vm0, %v51_v22  ;;  %v1852_v22 = vpack.c.bf16 %v921_v20, %v920_v19  ;;  %v926_v20 = vld [vmem:[%s2767_s3 + $0xc0] sm:$0xff] }
  0x2d   :  { %1853 = vmatprep.subr.bf16.mxu1 %v1852_v22 }
  0x2e   :  { %1772 = vmatmul.mubr.msk.f32.gmra.mrb[18].mxu0 %vm72_vm0, %v52_v23  ;;  %v905_v23 = vld [vmem:[%s2767_s3 + $0x18] sm:$0xff] }
  0x2f   :  { %1774 = vmatprep.mubr.msk.f32.mxu0 %vm72_vm0, %v53_v24  ;;  %v922_v24 = vld [vmem:[%s2767_s3 + $0xa0] sm:$0xff] }
  0x32   :  { %1775 = vmatmul.mubr.msk.f32.gmra.mrb[20].mxu0 %vm72_vm0, %v54_v25  ;;  %v923_v25 = vld [vmem:[%s2767_s3 + $0xa8] sm:$0xff] }
  0x33   :  { %1777 = vmatprep.mubr.msk.f32.mxu0 %vm72_vm0, %v55_v26 }
  0x36   :  { %1778 = vmatmul.mubr.msk.f32.gmra.mrb[22].mxu0 %vm72_vm0, %v56_v27  ;;  %v1854_v27 = vpack.c.bf16 %v905_v23, %v904_v21 }
  0x37   :  { %1780 = vmatprep.mubr.msk.f32.mxu0 %vm72_vm0, %v57_v28  ;;  %v1856_v28 = vpack.c.bf16 %v923_v25, %v922_v24 }
  0x38   :  { %1855 = vmatpush3.bf16.msra.mxu1 %v1854_v27 }
  0x39   :  { %1857 = vmatprep.subr.bf16.mxu1 %v1856_v28 }
  0x3a   :  { %1781 = vmatmul.mubr.msk.f32.gmra.mrb[24].mxu0 %vm72_vm0, %v58_v29  ;;  %v906_v29 = vld [vmem:[%s2767_s3 + $0x20] sm:$0xff] }
  0x3b   :  { %1783 = vmatprep.mubr.msk.f32.mxu0 %vm72_vm0, %v59_v30  ;;  %v907_v30 = vld [vmem:[%s2767_s3 + $0x28] sm:$0xff] }
  0x3e   :  { %1784 = vmatmul.mubr.msk.f32.gmra.mrb[26].mxu0 %vm72_vm0, %v60_v31 }
  0x3f   :  { %1786 = vmatprep.mubr.msk.f32.mxu0 %vm72_vm0, %v61_v32 }
  0x42   :  { %1787 = vmatmul.mubr.msk.f32.gmra.mrb[28].mxu0 %vm72_vm0, %v62_v33  ;;  %v2261_v33 = vld [vmem:[%s2766_s2] ss:$0 sm:$0xff]  ;;  %s1959_s2 = smov 96  }
  0x43   :  { %1789 = vmatprep.mubr.msk.f32.mxu0 %vm72_vm0, %v63_v34  ;;  %v1858_v34 = vpack.c.bf16 %v907_v30, %v906_v29 }
  0x45   :  { %1859 = vmatpush3.bf16.msra.mxu1 %v1858_v34 }
  0x46   :  { %1790 = vmatmul.mubr.msk.f32.gmra.mrb[30].mxu0 %vm72_vm0, %v64_v35 }
  0x47   :  { %1792 = vmatprep.mubr.msk.f32.mxu0 %vm72_vm0, %v65_v36 }
  0x4a   :  { %1793 = vmatmul.mubr.msk.f32.gmra.mrb[32].mxu0 %vm72_vm0, %v66_v37 }
  0x4b   :  { %1795 = vmatprep.mubr.msk.f32.mxu0 %vm72_vm0, %v67_v38 }
  0x4e   :  { %1796 = vmatmul.mubr.msk.f32.gmra.mrb[34].mxu0 %vm72_vm0, %v68_v39 }
  0xdd   :  { %v2172_v42 = vpop.f32.mrb[0].mxu0 }
  0xde   :  { %v251_v43 = vpop.f32.mrb[1].mxu0 }
  0xe1   :  { %v2174_v44 = vpop.f32.mrb[2].mxu0 }
  0xe2   :  { %v2176_v45 = vpop.f32.mrb[3].mxu0 }
  0xe5   :  { %v2178_v46 = vpop.f32.mrb[4].mxu0 }
  0xe6   :  { %v2180_v47 = vpop.f32.mrb[5].mxu0 }
  0xe9   :  { %v2182_v48 = vpop.f32.mrb[6].mxu0 }
  0xea   :  { %v2184_v49 = vpop.f32.mrb[7].mxu0 }
  0xed   :  { %v1758_v50 = vpop.f32.mrb[8].mxu0 }
  0xee   :  { %v430_v51 = vmax.f32 %v251_v43, %v1758_v50  ;;  %v2186_v52 = vpop.f32.mrb[9].mxu0 }
  0xf1   :  { %v1761_v53 = vpop.f32.mrb[10].mxu0 }
  0xf2   :  { %v432_v54 = vmax.f32 %v2176_v45, %v1761_v53  ;;  %v301_v55 = vpop.f32.mrb[11].mxu0  ;;  %v924_v53 = vld [vmem:[%s2767_s3 + $0xb0] sm:$0xff] }
  0xf3   :  { %v431_v56 = vmax.f32 %v2172_v42, %v301_v55  ;;  %v908_v55 = vld [vmem:[%s2767_s3 + $0x30] sm:$0xff] }
  0xf5   :  { %v2190_v57 = vpop.f32.mrb[12].mxu0 }
  0xf6   :  { %v434_v58 = vmax.f32 %v2180_v47, %v2190_v57  ;;  %v2194_v59 = vpop.f32.mrb[13].mxu0  ;;  %v910_v47 = vld [vmem:[%s2767_s3 + $0x40] sm:$0xff] }
  0xf7   :  { %v433_v60 = vmax.f32 %v2174_v44, %v2194_v59 }
  0xf9   :  { %v2198_v61 = vpop.f32.mrb[14].mxu0 }
  0xfa   :  { %v436_v62 = vmax.f32 %v2184_v49, %v2198_v61  ;;  %v2202_v63 = vpop.f32.mrb[15].mxu0 }
  0xfb   :  { %v435_v0 = vmax.f32 %v2178_v46, %v2202_v63  ;;  %v928_v46 = vld [vmem:[%s2767_s3 + $0xd0] sm:$0xff] }
  0xfc   :  { %v912_v63 = vld [vmem:[%s2767_s3 + $0x50] sm:$0xff] }
  0xfd   :  { %v2206_v1 = vpop.f32.mrb[16].mxu0 }
  0xfe   :  { %v438_v2 = vmax.f32 %v2186_v52, %v2206_v1  ;;  %v2210_v3 = vpop.f32.mrb[17].mxu0 }
  0xff   :  { %v437_v4 = vmax.f32 %v2182_v48, %v2210_v3 }
 0x101   :  { %v1773_v5 = vpop.f32.mrb[18].mxu0 }
 0x102   :  { %v341_v6 = vpop.f32.mrb[19].mxu0 }
 0x105   :  { %v1776_v7 = vpop.f32.mrb[20].mxu0 }
 0x106   :  { %v351_v8 = vpop.f32.mrb[21].mxu0 }
 0x109   :  { %v2214_v9 = vpop.f32.mrb[22].mxu0 }
 0x10a   :  { %v361_v10 = vpop.f32.mrb[23].mxu0 }
 0x10d   :  { %v2228_v16 = vpop.f32.mrb[24].mxu0 }
 0x10e   :  { %v2230_v18 = vpop.f32.mrb[25].mxu0 }
 0x111   :  { %v1785_v26 = vpop.f32.mrb[26].mxu0 }
 0x112   :  { %v439_v31 = vmax.f32 %v341_v6, %v1785_v26  ;;  %v2256_v32 = vpop.f32.mrb[27].mxu0 }
 0x114   :  { %v448_v35 = vmax.f32 %v430_v51, %v439_v31  ;;  %v925_v51 = vld [vmem:[%s2767_s3 + $0xb8] sm:$0xff] }
 0x115   :  { %v1788_v36 = vpop.f32.mrb[28].mxu0 }
 0x116   :  { %v464_v37 = vadd.f32 %v2261_v33, %v448_v35  ;;  %v441_v38 = vmax.f32 %v351_v8, %v1788_v36  ;;  %v391_v39 = vpop.f32.mrb[29].mxu0  ;;  %v909_v8 = vld [vmem:[%s2767_s3 + $0x38] sm:$0xff] }
 0x117   :  { %v440_v41 = vmax.f32 %v1773_v5, %v391_v39  ;;  %v1862_v13 = vpack.c.bf16 %v909_v8, %v908_v55 }
 0x118   :  { %v473_v42 = vmax.f32 %v464_v37, 0.0  ;;  %v450_v43 = vmax.f32 %v432_v54, %v441_v38 }
 0x119   :  { %v449_v45 = vmax.f32 %v431_v56, %v440_v41  ;;  %v1791_v50 = vpop.f32.mrb[30].mxu0  ;;  %v1860_v56 = vpack.c.bf16 %v925_v51, %v924_v53 }
 0x11a   :  { %483 = vst.msk [vmem:[#allocation2] sm:$0xff] %vm482_vm2, %v473_v42  ;;  %v466_v5 = vadd.f32 %v2261_v33, %v450_v43  ;;  %v443_v6 = vmax.f32 %v361_v10, %v1791_v50  ;;  %v401_v54 = vpop.f32.mrb[31].mxu0 }
 0x11b   :  { %v465_v11 = vadd.f32 %v2261_v33, %v449_v45  ;;  %v442_v12 = vmax.f32 %v1776_v7, %v401_v54  ;;  %1861 = vmatprep.subr.bf16.mxu1 %v1860_v56  ;;  %v927_v7 = vld [vmem:[%s2767_s3 + $0xc8] sm:$0xff] }
 0x11c   :  { %v475_v14 = vmax.f32 %v466_v5, 0.0  ;;  %v452_v15 = vmax.f32 %v434_v58, %v443_v6  ;;  %1863 = vmatpush3.bf16.msra.mxu1 %v1862_v13  ;;  %v1864_v59 = vpack.c.bf16 %v927_v7, %v926_v20  ;;  %v930_v20 = vld [vmem:[%s2767_s3 + $0xe0] sm:$0xff]  ;;  %v730_v7 = vpop.permute.xlu0 %729 }
 0x11d   :  { %v474_v17 = vmax.f32 %v465_v11, 0.0  ;;  %v451_v10 = vmax.f32 %v433_v60, %v442_v12  ;;  %v1794_v19 = vpop.f32.mrb[32].mxu0  ;;  %v911_v60 = vld [vmem:[%s2767_s3 + $0x48] sm:$0xff] }
 0x11e   :  { %485 = vst.msk [vmem:[#allocation2 + $0x10] sm:$0xff] %vm482_vm2, %v475_v14  ;;  %v468_v57 = vadd.f32 %v2261_v33, %v452_v15  ;;  %v445_v44 = vmax.f32 %v2230_v18, %v1794_v19  ;;  %v411_v58 = vpop.f32.mrb[33].mxu0  ;;  %v1866_v23 = vpack.c.bf16 %v911_v60, %v910_v47  ;;  %1865 = vmatprep.subr.bf16.mxu1 %v1864_v59  ;;  %v931_v47 = vld [vmem:[%s2767_s3 + $0xe8] sm:$0xff] }
 0x11f   :  { %484 = vst.msk [vmem:[#allocation2 + $0x8] sm:$0xff] %vm482_vm2, %v474_v17  ;;  %v467_v21 = vadd.f32 %v2261_v33, %v451_v10  ;;  %v444_v22 = vmax.f32 %v2214_v9, %v411_v58  ;;  %v1872_v58 = vpack.c.bf16 %v931_v47, %v930_v20  ;;  %v937_v47 = vld [vmem:[%s2767_s3 + $0x118] sm:$0xff] }
 0x120   :  { %v477_v24 = vmax.f32 %v468_v57, 0.0  ;;  %v454_v25 = vmax.f32 %v436_v62, %v445_v44  ;;  %1867 = vmatpush3.bf16.msra.mxu1 %v1866_v23  ;;  %v929_v62 = vld [vmem:[%s2767_s3 + $0xd8] sm:$0xff]  ;;  %v914_v57 = vld [vmem:[%s2767_s3 + $0x60] sm:$0xff]  ;;  %v915_v44 = vld [vmem:[%s2767_s3 + $0x68] sm:$0xff] }
 0x121   :  { %v476_v18 = vmax.f32 %v467_v21, 0.0  ;;  %v453_v26 = vmax.f32 %v435_v0, %v444_v22  ;;  %v1797_v27 = vpop.f32.mrb[34].mxu0  ;;  %v494_v28 = vld [vmem:[#allocation2] sm:$0xff]  ;;  %v1874_v59 = vpack.c.bf16 %v915_v44, %v914_v57  ;;  %v932_v21 = vld [vmem:[%s2767_s3 + $0xf0] sm:$0xff]  ;;  %v933_v22 = vld [vmem:[%s2767_s3 + $0xf8] sm:$0xff] }
 0x122   :  { %487 = vst.msk [vmem:[#allocation2 + $0x20] sm:$0xff] %vm482_vm2, %v477_v24  ;;  %v470_v29 = vadd.f32 %v2261_v33, %v454_v25  ;;  %v447_v9 = vmax.f32 %v2256_v32, %v1797_v27  ;;  %v421_v30 = vpop.f32.mrb[35].mxu0  ;;  %503 = vst.msk [vmem:[#allocation3] sm:$0xff] %vm482_vm2, %v494_v28  ;;  %v1868_v32 = vpack.c.bf16 %v929_v62, %v928_v46  ;;  %v916_v24 = vld [vmem:[%s2767_s3 + $0x70] sm:$0xff]  ;;  %v917_v25 = vld [vmem:[%s2767_s3 + $0x78] sm:$0xff] }
 0x123   :  { %486 = vst.msk [vmem:[#allocation2 + $0x18] sm:$0xff] %vm482_vm2, %v476_v18  ;;  %v469_v49 = vadd.f32 %v2261_v33, %v453_v26  ;;  %v446_v61 = vmax.f32 %v2228_v16, %v421_v30  ;;  %v913_v16 = vld [vmem:[%s2767_s3 + $0x58] sm:$0xff]  ;;  %v1876_v23 = vpack.c.bf16 %v933_v22, %v932_v21 }
 0x124   :  { %v479_v0 = vmax.f32 %v470_v29, 0.0  ;;  %v456_v31 = vmax.f32 %v438_v2, %v447_v9  ;;  %v1870_v37 = vpack.c.bf16 %v913_v16, %v912_v63  ;;  %1869 = vmatprep.subr.bf16.mxu1 %v1868_v32  ;;  %v1878_v29 = vpack.c.bf16 %v917_v25, %v916_v24 }
 0x125   :  { %v478_v34 = vmax.f32 %v469_v49, 0.0  ;;  %v455_v35 = vmax.f32 %v437_v4, %v446_v61  ;;  %v696_v36 = vld [vmem:[#allocation2 + $0x10] sm:$0xff] }
 0x126   :  { %v2334_v38 = vld [vmem:[#allocation2 + $0xe] sm:$0xff]  ;;  %489 = vst.msk [vmem:[#allocation2 + $0x30] sm:$0xff] %vm482_vm2, %v479_v0  ;;  %v472_v39 = vadd.f32 %v2261_v33, %v456_v31  ;;  %715 = vrot.lane.b32.xlu0 %v696_v36, %s1957_s1  ;;  %505 = vst.msk [vmem:[#allocation3 + $0x30] sm:$0xff] %vm482_vm2, %v696_v36  ;;  %1871 = vmatpush3.bf16.msra.mxu1 %v1870_v37  ;;  %v567_v43 = vld [vmem:[#allocation2 + $0x2] sm:$0xff] }
 0x127   :  { %v749_v52 = vld [vmem:[#allocation2 + $0xc] sm:$0xff]  ;;  %866 = vst.msk [vmem:[#allocation3 + $0x10] sm:$0xff] %vm482_vm2, %v2334_v38  ;;  %488 = vst.msk [vmem:[#allocation2 + $0x28] sm:$0xff] %vm482_vm2, %v478_v34  ;;  %v471_v48 = vadd.f32 %v2261_v33, %v455_v35  ;;  %v512_v50 = vld [vmem:[#allocation2 + $0x1] sm:$0xff]  ;;  %1873 = vmatprep.subr.bf16.mxu1 %v1872_v58 }
 0x128   :  { %v695_v1 = vld [vmem:[#allocation2 + $0x8] sm:$0xff]  ;;  %767 = vrot.lane.b32.xlu1 %v749_v52, %s1958_s25  ;;  %v481_v2 = vmax.f32 %v472_v39, 0.0  ;;  %v1960_v52 = vmov 0.0|0.0  }
 0x129   :  { %504 = vst.msk [vmem:[#allocation3 + $0x18] sm:$0xff] %vm482_vm2, %v695_v1  ;;  %v480_v3 = vmax.f32 %v471_v48, 0.0  ;;  %v698_v4 = vld [vmem:[#allocation2 + $0x20] sm:$0xff]  ;;  %v678_v41 = vld [vmem:[#allocation2 + $0xf] sm:$0xff] }
 0x12a   :  { %v677_v42 = vld [vmem:[#allocation2 + $0x7] sm:$0xff]  ;;  %491 = vst.msk [vmem:[#allocation2 + $0x40] sm:$0xff] %vm482_vm2, %v481_v2  ;;  %713 = vrot.lane.b32.xlu0 %v695_v1, %s1957_s1  ;;  %687 = vst.msk [vmem:[#allocation3 + $0x20] sm:$0xff] %vm482_vm2, %v678_v41  ;;  %v2353_v33 = vld [vmem:[#allocation2 + $0x18] sm:$0xff]  ;;  %1875 = vmatpush3.bf16.msra.mxu1 %v1874_v59 }
 0x12b   :  { %686 = vst.msk [vmem:[#allocation3 + $0x8] sm:$0xff] %vm482_vm2, %v677_v42  ;;  %507 = vst.msk [vmem:[#allocation3 + $0x60] sm:$0xff] %vm482_vm2, %v698_v4  ;;  %v2355_v45 = vld [vmem:[#allocation2 + $0x16] sm:$0xff]  ;;  %v2361_v51 = vld [vmem:[#allocation2 + $0x1e] sm:$0xff]  ;;  %1877 = vmatprep.subr.bf16.mxu1 %v1876_v23 }
 0x12c   :  { %490 = vst.msk [vmem:[#allocation2 + $0x38] sm:$0xff] %vm482_vm2, %v480_v3  ;;  %585 = vrot.lane.b32.xlu1 %v567_v43, %s1958_s25  ;;  %506 = vst.msk [vmem:[#allocation3 + $0x48] sm:$0xff] %vm482_vm2, %v2353_v33  ;;  %v622_v55 = vld [vmem:[#allocation2 + $0x6] sm:$0xff]  ;;  %v750_v17 = vld [vmem:[#allocation2 + $0x14] sm:$0xff] }
 0x12d   :  { %v2359_v53 = vld [vmem:[#allocation2 + $0x30] sm:$0xff]  ;;  %867 = vst.msk [vmem:[#allocation3 + $0x28] sm:$0xff] %vm482_vm2, %v2355_v45  ;;  %868 = vst.msk [vmem:[#allocation3 + $0x40] sm:$0xff] %vm482_vm2, %v2361_v51  ;;  %v680_v60 = vld [vmem:[#allocation2 + $0x1f] sm:$0xff] }
 0x12e   :  { %530 = vrot.lane.b32.xlu0 %v512_v50, %s1957_s1  ;;  %509 = vst.msk [vmem:[#allocation3 + $0x90] sm:$0xff] %vm482_vm2, %v2359_v53  ;;  %v2371_v5 = vld [vmem:[#allocation2 + $0x28] sm:$0xff]  ;;  %689 = vst.msk [vmem:[#allocation3 + $0x50] sm:$0xff] %vm482_vm2, %v680_v60  ;;  %v679_v18 = vld [vmem:[#allocation2 + $0x17] sm:$0xff]  ;;  %1879 = vmatpush3.bf16.msra.mxu1 %v1878_v29 }
 0x12f   :  { %v2373_v6 = vld [vmem:[#allocation2 + $0x26] sm:$0xff]  ;;  %508 = vst.msk [vmem:[#allocation3 + $0x78] sm:$0xff] %vm482_vm2, %v2371_v5  ;;  %v2382_v11 = vld [vmem:[#allocation2 + $0x2e] sm:$0xff]  ;;  %688 = vst.msk [vmem:[#allocation3 + $0x38] sm:$0xff] %vm482_vm2, %v679_v18  ;;  %1880 = vmatprep.subr.bf16.mxu1 %v1960_v52 }
 0x130   :  { %640 = vrot.lane.b32.xlu1 %v622_v55, %s1959_s2  ;;  %v803_v54 = vld [vmem:[#allocation2 + $0xd] sm:$0xff]  ;;  %869 = vst.msk [vmem:[#allocation3 + $0x58] sm:$0xff] %vm482_vm2, %v2373_v6  ;;  %870 = vst.msk [vmem:[#allocation3 + $0x70] sm:$0xff] %vm482_vm2, %v2382_v11  ;;  %v804_v30 = vld [vmem:[#allocation2 + $0x15] sm:$0xff] }
 0x131   :  { %v2377_v56 = vld [vmem:[#allocation2 + $0x40] sm:$0xff]  ;;  %v513_v8 = vld [vmem:[#allocation2 + $0x9] sm:$0xff]  ;;  %v514_v49 = vld [vmem:[#allocation2 + $0x11] sm:$0xff] }
 0x132   :  { %821 = vrot.lane.b32.xlu0 %v803_v54, %s1959_s2  ;;  %511 = vst.msk [vmem:[#allocation3 + $0xc0] sm:$0xff] %vm482_vm2, %v2377_v56  ;;  %v568_v14 = vld [vmem:[#allocation2 + $0xa] sm:$0xff]  ;;  %v569_v61 = vld [vmem:[#allocation2 + $0x12] sm:$0xff]  ;;  %v751_v46 = vld [vmem:[#allocation2 + $0x1c] sm:$0xff] }
 0x133   :  { %v2389_v12 = vld [vmem:[#allocation2 + $0x38] sm:$0xff]  ;;  %v2401_v10 = vld [vmem:[#allocation2 + $0x46] sm:$0xff]  ;;  %v682_v26 = vld [vmem:[#allocation2 + $0x2f] sm:$0xff] }
 0x134   :  { %532 = vrot.lane.b32.xlu1 %v513_v8, %s1957_s1  ;;  %v2391_v13 = vld [vmem:[#allocation2 + $0x36] sm:$0xff]  ;;  %510 = vst.msk [vmem:[#allocation3 + $0xa8] sm:$0xff] %vm482_vm2, %v2389_v12  ;;  %v2396_v15 = vld [vmem:[#allocation2 + $0x3e] sm:$0xff]  ;;  %v685_v19 = vld [vmem:[#allocation2 + $0x47] sm:$0xff] }
 0x135   :  { %871 = vst.msk [vmem:[#allocation3 + $0x88] sm:$0xff] %vm482_vm2, %v2391_v13  ;;  %872 = vst.msk [vmem:[#allocation3 + $0xa0] sm:$0xff] %vm482_vm2, %v2396_v15  ;;  %v681_v27 = vld [vmem:[#allocation2 + $0x27] sm:$0xff]  ;;  %v684_v28 = vld [vmem:[#allocation2 + $0x3f] sm:$0xff] }
 0x136   :  { %719 = vrot.lane.b32.xlu0 %v698_v4, %s1957_s1  ;;  %694 = vst.msk [vmem:[#allocation3 + $0xc8] sm:$0xff] %vm482_vm2, %v685_v19  ;;  %873 = vst.msk [vmem:[#allocation3 + $0xb8] sm:$0xff] %vm482_vm2, %v2401_v10  ;;  %v683_v9 = vld [vmem:[#allocation2 + $0x37] sm:$0xff]  ;;  %v752_v31 = vld [vmem:[#allocation2 + $0x24] sm:$0xff] }
 0x137   :  { %748 = vst.msk [vmem:[#allocation3 + $0xc8] sm:$0xff] %vm557_vm3, %v730_v7  ;;  %v805_v62 = vld [vmem:[#allocation2 + $0x1d] sm:$0xff]  ;;  %v806_v32 = vld [vmem:[#allocation2 + $0x25] sm:$0xff]  ;;  %v807_v36 = vld [vmem:[#allocation2 + $0x2d] sm:$0xff] }
 0x138   :  { %587 = vrot.lane.b32.xlu1 %v568_v14, %s1958_s25  ;;  %691 = vst.msk [vmem:[#allocation3 + $0x80] sm:$0xff] %vm482_vm2, %v682_v26  ;;  %690 = vst.msk [vmem:[#allocation3 + $0x68] sm:$0xff] %vm482_vm2, %v681_v27  ;;  %v515_v63 = vld [vmem:[#allocation2 + $0x19] sm:$0xff]  ;;  %v516_v16 = vld [vmem:[#allocation2 + $0x21] sm:$0xff] }
 0x139   :  { %693 = vst.msk [vmem:[#allocation3 + $0xb0] sm:$0xff] %vm482_vm2, %v684_v28  ;;  %692 = vst.msk [vmem:[#allocation3 + $0x98] sm:$0xff] %vm482_vm2, %v683_v9  ;;  %v570_v0 = vld [vmem:[#allocation2 + $0x1a] sm:$0xff]  ;;  %v571_v34 = vld [vmem:[#allocation2 + $0x22] sm:$0xff] }
 0x13a   :  { %769 = vrot.lane.b32.xlu0 %v750_v17, %s1958_s25  ;;  %v753_v35 = vld [vmem:[#allocation2 + $0x2c] sm:$0xff]  ;;  %v756_v39 = vld [vmem:[#allocation2 + $0x44] sm:$0xff]  ;;  %v754_v2 = vld [vmem:[#allocation2 + $0x34] sm:$0xff] }
 0x13b   :  { %v517_v37 = vld [vmem:[#allocation2 + $0x29] sm:$0xff]  ;;  %v520_v48 = vld [vmem:[#allocation2 + $0x41] sm:$0xff]  ;;  %v518_v3 = vld [vmem:[#allocation2 + $0x31] sm:$0xff] }
 0x13c   :  { %642 = vrot.lane.b32.xlu1 %v2334_v38, %s1959_s2  ;;  %v572_v38 = vld [vmem:[#allocation2 + $0x2a] sm:$0xff]  ;;  %v808_v4 = vld [vmem:[#allocation2 + $0x35] sm:$0xff]  ;;  %v575_v42 = vld [vmem:[#allocation2 + $0x42] sm:$0xff] }
 0x13d   :  { %v810_v1 = vld [vmem:[#allocation2 + $0x45] sm:$0xff]  ;;  %v573_v41 = vld [vmem:[#allocation2 + $0x32] sm:$0xff]  ;;  %v755_v43 = vld [vmem:[#allocation2 + $0x3c] sm:$0xff] }
 0x13e   :  { %823 = vrot.lane.b32.xlu0 %v804_v30, %s1959_s2  ;;  %v757_v50 = vld [vmem:[#allocation2 + $0x4c] sm:$0xff]  ;;  %v934_v14 = vld [vmem:[%s2767_s3 + $0x100] sm:$0xff] }
 0x13f   :  { %v936_v7 = vld [vmem:[%s2767_s3 + $0x110] sm:$0xff] }
 0x140   :  { %534 = vrot.lane.b32.xlu1 %v514_v49, %s1957_s1  ;;  %v1884_v58 = vpack.c.bf16 %v937_v47, %v936_v7  ;;  %v877_v7 = vld [vmem:[#allocation3 + $0x10] sm:$0xff]  ;;  %v880_v47 = vld [vmem:[#allocation3 + $0x28] sm:$0xff] }
 0x142   :  { %717 = vrot.lane.b32.xlu0 %v2353_v33, %s1957_s1  ;;  %v809_v33 = vld [vmem:[#allocation2 + $0x3d] sm:$0xff] }
 0x144   :  { %589 = vrot.lane.b32.xlu1 %v569_v61, %s1958_s25 }
 0x146   :  { %771 = vrot.lane.b32.xlu0 %v751_v46, %s1958_s25 }
 0x148   :  { %644 = vrot.lane.b32.xlu1 %v2355_v45, %s1959_s2  ;;  %v519_v45 = vld [vmem:[#allocation2 + $0x39] sm:$0xff] }
 0x14a   :  { %825 = vrot.lane.b32.xlu0 %v805_v62, %s1959_s2 }
 0x14c   :  { %536 = vrot.lane.b32.xlu1 %v515_v63, %s1957_s1 }
 0x14e   :  { %723 = vrot.lane.b32.xlu0 %v2359_v53, %s1957_s1  ;;  %v574_v53 = vld [vmem:[#allocation2 + $0x3a] sm:$0xff] }
 0x150   :  { %591 = vrot.lane.b32.xlu1 %v570_v0, %s1958_s25 }
 0x152   :  { %773 = vrot.lane.b32.xlu0 %v752_v31, %s1958_s25 }
 0x154   :  { %646 = vrot.lane.b32.xlu1 %v2361_v51, %s1959_s2  ;;  %v811_v51 = vld [vmem:[#allocation2 + $0x4d] sm:$0xff] }
 0x156   :  { %827 = vrot.lane.b32.xlu0 %v806_v32, %s1959_s2 }
 0x158   :  { %538 = vrot.lane.b32.xlu1 %v516_v16, %s1957_s1 }
 0x15a   :  { %721 = vrot.lane.b32.xlu0 %v2371_v5, %s1957_s1 }
 0x15c   :  { %593 = vrot.lane.b32.xlu1 %v571_v34, %s1958_s25 }
 0x15e   :  { %775 = vrot.lane.b32.xlu0 %v753_v35, %s1958_s25 }
 0x160   :  { %648 = vrot.lane.b32.xlu1 %v2373_v6, %s1959_s2 }
 0x162   :  { %829 = vrot.lane.b32.xlu0 %v807_v36, %s1959_s2 }
 0x164   :  { %540 = vrot.lane.b32.xlu1 %v517_v37, %s1957_s1 }
 0x166   :  { %727 = vrot.lane.b32.xlu0 %v2377_v56, %s1957_s1 }
 0x168   :  { %595 = vrot.lane.b32.xlu1 %v572_v38, %s1958_s25 }
 0x16a   :  { %781 = vrot.lane.b32.xlu0 %v756_v39, %s1958_s25 }
 0x16c   :  { %650 = vrot.lane.b32.xlu1 %v2382_v11, %s1959_s2 }
 0x16e   :  { %835 = vrot.lane.b32.xlu0 %v810_v1, %s1959_s2 }
 0x170   :  { %546 = vrot.lane.b32.xlu1 %v520_v48, %s1957_s1 }
 0x172   :  { %777 = vrot.lane.b32.xlu0 %v754_v2, %s1958_s25 }
 0x174   :  { %542 = vrot.lane.b32.xlu1 %v518_v3, %s1957_s1 }
 0x176   :  { %831 = vrot.lane.b32.xlu0 %v808_v4, %s1959_s2 }
 0x178   :  { %597 = vrot.lane.b32.xlu1 %v573_v41, %s1958_s25 }
 0x17a   :  { %725 = vrot.lane.b32.xlu0 %v2389_v12, %s1957_s1 }
 0x17c   :  { %601 = vrot.lane.b32.xlu1 %v575_v42, %s1958_s25 }
 0x17e   :  { %779 = vrot.lane.b32.xlu0 %v755_v43, %s1958_s25 }
 0x180   :  { %652 = vrot.lane.b32.xlu1 %v2391_v13, %s1959_s2 }
 0x182   :  { %833 = vrot.lane.b32.xlu0 %v809_v33, %s1959_s2 }
 0x184   :  { %544 = vrot.lane.b32.xlu1 %v519_v45, %s1957_s1 }
 0x186   :  { %783 = vrot.lane.b32.xlu0 %v757_v50, %s1958_s25 }
 0x188   :  { %599 = vrot.lane.b32.xlu1 %v574_v53, %s1958_s25 }
 0x18a   :  { %837 = vrot.lane.b32.xlu0 %v811_v51, %s1959_s2 }
 0x18c   :  { %654 = vrot.lane.b32.xlu1 %v2396_v15, %s1959_s2  ;;  %v935_v15 = vld [vmem:[%s2767_s3 + $0x108] sm:$0xff] }
 0x190   :  { %656 = vrot.lane.b32.xlu1 %v2401_v10, %s1959_s2  ;;  %v1881_v10 = vpack.c.bf16 %v935_v15, %v934_v14 }
 0x198   :  { %v716_v55 = vpop.permute.xlu0 %715 }
 0x199   :  { %741 = vst.msk [vmem:[#allocation3 + $0x20] sm:$0xff] %vm557_vm3, %v716_v55 }
 0x19a   :  { %v768_v5 = vpop.permute.xlu1 %767 }
 0x19c   :  { %v714_v6 = vpop.permute.xlu0 %713 }
 0x19d   :  { %740 = vst.msk [vmem:[#allocation3 + $0x8] sm:$0xff] %vm557_vm3, %v714_v6 }
 0x19e   :  { %v586_v54 = vpop.permute.xlu1 %585  ;;  %794 = vst.msk [vmem:[#allocation3 + $0x8] sm:$0xff] %vm612_vm4, %v768_v5 }
 0x1a0   :  { %v531_v56 = vpop.permute.xlu0 %530 }
 0x1a1   :  { %558 = vst.msk [vmem:[#allocation3] sm:$0xff] %vm557_vm3, %v531_v56 }
 0x1a2   :  { %v641_v8 = vpop.permute.xlu1 %640  ;;  %613 = vst.msk [vmem:[#allocation3] sm:$0xff] %vm612_vm4, %v586_v54 }
 0x1a3   :  { %668 = vst.msk [vmem:[#allocation3] sm:$0xff] %vm667_vm5, %v641_v8 }
 0x1a4   :  { %v822_v11 = vpop.permute.xlu0 %821 }
 0x1a5   :  { %848 = vst.msk [vmem:[#allocation3 + $0x8] sm:$0xff] %vm667_vm5, %v822_v11 }
 0x1a6   :  { %v533_v12 = vpop.permute.xlu1 %532 }
 0x1a7   :  { %559 = vst.msk [vmem:[#allocation3 + $0x18] sm:$0xff] %vm557_vm3, %v533_v12 }
 0x1a8   :  { %v720_v13 = vpop.permute.xlu0 %719 }
 0x1a9   :  { %743 = vst.msk [vmem:[#allocation3 + $0x50] sm:$0xff] %vm557_vm3, %v720_v13 }
 0x1aa   :  { %v588_v17 = vpop.permute.xlu1 %587  ;;  %v875_v44 = vld [vmem:[#allocation3] sm:$0xff] }
 0x1ab   :  { %614 = vst.msk [vmem:[#allocation3 + $0x18] sm:$0xff] %vm612_vm4, %v588_v17 }
 0x1ac   :  { %v770_v19 = vpop.permute.xlu0 %769  ;;  %v876_v20 = vld [vmem:[#allocation3 + $0x8] sm:$0xff] }
 0x1ad   :  { %795 = vst.msk [vmem:[#allocation3 + $0x20] sm:$0xff] %vm612_vm4, %v770_v19  ;;  %1029 = vmatprep.mubr.f32.mxu1 %v876_v20 }
 0x1ae   :  { %v643_v57 = vpop.permute.xlu1 %642  ;;  %1030 = vmatmul.mubr.f32.vlgmr.msra.gmra.mrb[0].mxu1 %v875_v44  ;;  %v886_v44 = vld [vmem:[#allocation3 + $0x58] sm:$0xff] }
 0x1af   :  { %669 = vst.msk [vmem:[#allocation3 + $0x18] sm:$0xff] %vm667_vm5, %v643_v57  ;;  %1882 = vmatpush3.bf16.msra.mxu1 %v1881_v10  ;;  %v883_v57 = vld [vmem:[#allocation3 + $0x40] sm:$0xff] }
 0x1b0   :  { %v824_v59 = vpop.permute.xlu0 %823  ;;  %1883 = vmatprep.subr.bf16.mxu1 %v1960_v52 }
 0x1b1   :  { %849 = vst.msk [vmem:[#allocation3 + $0x20] sm:$0xff] %vm667_vm5, %v824_v59  ;;  %v892_v59 = vld [vmem:[#allocation3 + $0x88] sm:$0xff] }
 0x1b2   :  { %v535_v60 = vpop.permute.xlu1 %534 }
 0x1b3   :  { %560 = vst.msk [vmem:[#allocation3 + $0x30] sm:$0xff] %vm557_vm3, %v535_v60  ;;  %1885 = vmatpush3.bf16.msra.mxu1 %v1884_v58  ;;  %v889_v58 = vld [vmem:[#allocation3 + $0x70] sm:$0xff]  ;;  %v895_v60 = vld [vmem:[#allocation3 + $0xa0] sm:$0xff] }
 0x1b4   :  { %v718_v21 = vpop.permute.xlu0 %717 }
 0x1b5   :  { %742 = vst.msk [vmem:[#allocation3 + $0x38] sm:$0xff] %vm557_vm3, %v718_v21  ;;  %v898_v21 = vld [vmem:[#allocation3 + $0xb8] sm:$0xff] }
 0x1b6   :  { %v590_v22 = vpop.permute.xlu1 %589  ;;  %v878_v18 = vld [vmem:[#allocation3 + $0x18] sm:$0xff] }
 0x1b7   :  { %615 = vst.msk [vmem:[#allocation3 + $0x30] sm:$0xff] %vm612_vm4, %v590_v22 }
 0x1b8   :  { %v772_v23 = vpop.permute.xlu0 %771  ;;  %v879_v24 = vld [vmem:[#allocation3 + $0x20] sm:$0xff] }
 0x1b9   :  { %796 = vst.msk [vmem:[#allocation3 + $0x38] sm:$0xff] %vm612_vm4, %v772_v23  ;;  %1034 = vmatprep.mubr.f32.mxu1 %v879_v24 }
 0x1ba   :  { %v645_v25 = vpop.permute.xlu1 %644  ;;  %1035 = vmatmul.mubr.f32.gmra.mrb[2].mxu1 %v878_v18 }
 0x1bb   :  { %670 = vst.msk [vmem:[#allocation3 + $0x30] sm:$0xff] %vm667_vm5, %v645_v25 }
 0x1bc   :  { %v826_v26 = vpop.permute.xlu0 %825 }
 0x1bd   :  { %850 = vst.msk [vmem:[#allocation3 + $0x38] sm:$0xff] %vm667_vm5, %v826_v26 }
 0x1be   :  { %v537_v27 = vpop.permute.xlu1 %536 }
 0x1bf   :  { %561 = vst.msk [vmem:[#allocation3 + $0x48] sm:$0xff] %vm557_vm3, %v537_v27  ;;  %v1331_v27 = vld [vmem:[%s2769_s5 + $0x80] sm:$0xff] }
 0x1c0   :  { %v724_v28 = vpop.permute.xlu0 %723 }
 0x1c1   :  { %745 = vst.msk [vmem:[#allocation3 + $0x80] sm:$0xff] %vm557_vm3, %v724_v28  ;;  %v1332_v28 = vld [vmem:[%s2769_s5 + $0x88] sm:$0xff] }
 0x1c2   :  { %v592_v29 = vpop.permute.xlu1 %591  ;;  %v881_v61 = vld [vmem:[#allocation3 + $0x30] sm:$0xff] }
 0x1c3   :  { %616 = vst.msk [vmem:[#allocation3 + $0x48] sm:$0xff] %vm612_vm4, %v592_v29  ;;  %v1315_v29 = vld [vmem:[%s2769_s5] sm:$0xff] }
 0x1c4   :  { %v774_v9 = vpop.permute.xlu0 %773  ;;  %v882_v30 = vld [vmem:[#allocation3 + $0x38] sm:$0xff] }
 0x1c5   :  { %797 = vst.msk [vmem:[#allocation3 + $0x50] sm:$0xff] %vm612_vm4, %v774_v9  ;;  %1039 = vmatprep.mubr.f32.mxu1 %v882_v30  ;;  %v1886_v9 = vpack.c.bf16 %v1332_v28, %v1331_v27  ;;  %v1316_v30 = vld [vmem:[%s2769_s5 + $0x8] sm:$0xff] }
 0x1c6   :  { %v647_v49 = vpop.permute.xlu1 %646  ;;  %1040 = vmatmul.mubr.f32.gmra.mrb[4].mxu1 %v881_v61  ;;  %v1334_v61 = vld [vmem:[%s2769_s5 + $0x98] sm:$0xff] }
 0x1c7   :  { %671 = vst.msk [vmem:[#allocation3 + $0x48] sm:$0xff] %vm667_vm5, %v647_v49  ;;  %v1333_v49 = vld [vmem:[%s2769_s5 + $0x90] sm:$0xff]  ;;  %1887 = vmatprep.subr.bf16.mxu0 %v1886_v9 }
 0x1c8   :  { %v828_v46 = vpop.permute.xlu0 %827 }
 0x1c9   :  { %851 = vst.msk [vmem:[#allocation3 + $0x50] sm:$0xff] %vm667_vm5, %v828_v46  ;;  %v1888_v46 = vpack.c.bf16 %v1316_v30, %v1315_v29  ;;  %v1962_v29 = vmov 1983009808  }
 0x1ca   :  { %v539_v62 = vpop.permute.xlu1 %538  ;;  %v1212_v9 = vunpack.c.l.s4 %v1962_v29 }
 0x1cb   :  { %562 = vst.msk [vmem:[#allocation3 + $0x60] sm:$0xff] %vm557_vm3, %v539_v62  ;;  %v1890_v62 = vpack.c.bf16 %v1334_v61, %v1333_v49  ;;  %1889 = vmatpush3.bf16.msra.mxu0 %v1888_v46  ;;  %v2663_v49 = vld [vmem:[%s2768_s4] sm:$0x1] }
 0x1cc   :  { %v722_v63 = vpop.permute.xlu0 %721 }
 0x1cd   :  { %744 = vst.msk [vmem:[#allocation3 + $0x68] sm:$0xff] %vm557_vm3, %v722_v63  ;;  %v1317_v63 = vld [vmem:[%s2769_s5 + $0x10] sm:$0xff]  ;;  %1891 = vmatprep.subr.bf16.mxu0 %v1890_v62 }
 0x1ce   :  { %v594_v0 = vpop.permute.xlu1 %593  ;;  %v884_v34 = vld [vmem:[#allocation3 + $0x48] sm:$0xff] }
 0x1cf   :  { %617 = vst.msk [vmem:[#allocation3 + $0x60] sm:$0xff] %vm612_vm4, %v594_v0  ;;  %v1318_v0 = vld [vmem:[%s2769_s5 + $0x18] sm:$0xff] }
 0x1d0   :  { %v776_v31 = vpop.permute.xlu0 %775  ;;  %v885_v32 = vld [vmem:[#allocation3 + $0x50] sm:$0xff] }
 0x1d1   :  { %798 = vst.msk [vmem:[#allocation3 + $0x68] sm:$0xff] %vm612_vm4, %v776_v31  ;;  %1044 = vmatprep.mubr.f32.mxu1 %v885_v32  ;;  %v1335_v31 = vld [vmem:[%s2769_s5 + $0xa0] sm:$0xff]  ;;  %v1336_v32 = vld [vmem:[%s2769_s5 + $0xa8] sm:$0xff] }
 0x1d2   :  { %v649_v16 = vpop.permute.xlu1 %648  ;;  %1045 = vmatmul.mubr.f32.gmra.mrb[6].mxu1 %v884_v34  ;;  %v1894_v34 = vpack.c.bf16 %v1336_v32, %v1335_v31  ;;  %v1213_v31 = vunpack.c.0.s8 %v1212_v9 }
 0x1d3   :  { %672 = vst.msk [vmem:[#allocation3 + $0x60] sm:$0xff] %vm667_vm5, %v649_v16  ;;  %v1892_v16 = vpack.c.bf16 %v1318_v0, %v1317_v63 }
 0x1d4   :  { %v830_v35 = vpop.permute.xlu0 %829 }
 0x1d5   :  { %852 = vst.msk [vmem:[#allocation3 + $0x68] sm:$0xff] %vm667_vm5, %v830_v35  ;;  %v1319_v35 = vld [vmem:[%s2769_s5 + $0x20] sm:$0xff]  ;;  %1893 = vmatpush3.bf16.msra.mxu0 %v1892_v16 }
 0x1d6   :  { %v541_v36 = vpop.permute.xlu1 %540  ;;  %1895 = vmatprep.subr.bf16.mxu0 %v1894_v34 }
 0x1d7   :  { %563 = vst.msk [vmem:[#allocation3 + $0x78] sm:$0xff] %vm557_vm3, %v541_v36  ;;  %v1320_v36 = vld [vmem:[%s2769_s5 + $0x28] sm:$0xff] }
 0x1d8   :  { %v728_v37 = vpop.permute.xlu0 %727 }
 0x1d9   :  { %747 = vst.msk [vmem:[#allocation3 + $0xb0] sm:$0xff] %vm557_vm3, %v728_v37  ;;  %v1337_v37 = vld [vmem:[%s2769_s5 + $0xb0] sm:$0xff] }
 0x1da   :  { %v596_v38 = vpop.permute.xlu1 %595  ;;  %v887_v2 = vld [vmem:[#allocation3 + $0x60] sm:$0xff] }
 0x1db   :  { %618 = vst.msk [vmem:[#allocation3 + $0x78] sm:$0xff] %vm612_vm4, %v596_v38  ;;  %v1338_v38 = vld [vmem:[%s2769_s5 + $0xb8] sm:$0xff] }
 0x1dc   :  { %v782_v39 = vpop.permute.xlu0 %781  ;;  %v888_v1 = vld [vmem:[#allocation3 + $0x68] sm:$0xff] }
 0x1dd   :  { %801 = vst.msk [vmem:[#allocation3 + $0xb0] sm:$0xff] %vm612_vm4, %v782_v39  ;;  %1048 = vmatprep.mubr.f32.mxu1 %v888_v1  ;;  %v1896_v39 = vpack.c.bf16 %v1320_v36, %v1319_v35 }
 0x1de   :  { %v651_v48 = vpop.permute.xlu1 %650  ;;  %1049 = vmatmul.mubr.f32.gmra.mrb[8].mxu1 %v887_v2  ;;  %v1321_v2 = vld [vmem:[%s2769_s5 + $0x30] sm:$0xff] }
 0x1df   :  { %673 = vst.msk [vmem:[#allocation3 + $0x78] sm:$0xff] %vm667_vm5, %v651_v48  ;;  %v1898_v48 = vpack.c.bf16 %v1338_v38, %v1337_v37  ;;  %1897 = vmatpush3.bf16.msra.mxu0 %v1896_v39 }
 0x1e0   :  { %v836_v3 = vpop.permute.xlu0 %835 }
 0x1e1   :  { %855 = vst.msk [vmem:[#allocation3 + $0xb0] sm:$0xff] %vm667_vm5, %v836_v3  ;;  %v1322_v3 = vld [vmem:[%s2769_s5 + $0x38] sm:$0xff]  ;;  %1899 = vmatprep.subr.bf16.mxu0 %v1898_v48 }
 0x1e2   :  { %v547_v4 = vpop.permute.xlu1 %546 }
 0x1e3   :  { %566 = vst.msk [vmem:[#allocation3 + $0xc0] sm:$0xff] %vm557_vm3, %v547_v4 }
 0x1e4   :  { %v778_v41 = vpop.permute.xlu0 %777 }
 0x1e5   :  { %799 = vst.msk [vmem:[#allocation3 + $0x80] sm:$0xff] %vm612_vm4, %v778_v41  ;;  %v1339_v41 = vld [vmem:[%s2769_s5 + $0xc0] sm:$0xff] }
 0x1e6   :  { %v543_v42 = vpop.permute.xlu1 %542  ;;  %v890_v5 = vld [vmem:[#allocation3 + $0x78] sm:$0xff] }
 0x1e7   :  { %564 = vst.msk [vmem:[#allocation3 + $0x90] sm:$0xff] %vm557_vm3, %v543_v42  ;;  %v1340_v42 = vld [vmem:[%s2769_s5 + $0xc8] sm:$0xff] }
 0x1e8   :  { %v832_v43 = vpop.permute.xlu0 %831  ;;  %v897_v15 = vld [vmem:[#allocation3 + $0xb0] sm:$0xff] }
 0x1e9   :  { %853 = vst.msk [vmem:[#allocation3 + $0x80] sm:$0xff] %vm667_vm5, %v832_v43 }
 0x1ea   :  { %v598_v33 = vpop.permute.xlu1 %597 }
 0x1eb   :  { %619 = vst.msk [vmem:[#allocation3 + $0x90] sm:$0xff] %vm612_vm4, %v598_v33  ;;  %v1900_v33 = vpack.c.bf16 %v1322_v3, %v1321_v2  ;;  %v1341_v2 = vld [vmem:[%s2769_s5 + $0xd0] sm:$0xff]  ;;  %v1342_v3 = vld [vmem:[%s2769_s5 + $0xd8] sm:$0xff] }
 0x1ec   :  { %v726_v45 = vpop.permute.xlu0 %725 }
 0x1ed   :  { %746 = vst.msk [vmem:[#allocation3 + $0x98] sm:$0xff] %vm557_vm3, %v726_v45  ;;  %v1902_v45 = vpack.c.bf16 %v1340_v42, %v1339_v41  ;;  %1901 = vmatpush3.bf16.msra.mxu0 %v1900_v33 }
 0x1ee   :  { %v602_v50 = vpop.permute.xlu1 %601 }
 0x1ef   :  { %621 = vst.msk [vmem:[#allocation3 + $0xc0] sm:$0xff] %vm612_vm4, %v602_v50  ;;  %v1323_v50 = vld [vmem:[%s2769_s5 + $0x40] sm:$0xff]  ;;  %1903 = vmatprep.subr.bf16.mxu0 %v1902_v45  ;;  %v1906_v45 = vpack.c.bf16 %v1342_v3, %v1341_v2 }
 0x1f0   :  { %v780_v53 = vpop.permute.xlu0 %779  ;;  %v891_v51 = vld [vmem:[#allocation3 + $0x80] sm:$0xff] }
 0x1f1   :  { %800 = vst.msk [vmem:[#allocation3 + $0x98] sm:$0xff] %vm612_vm4, %v780_v53  ;;  %1053 = vmatprep.mubr.f32.mxu1 %v891_v51  ;;  %v1324_v53 = vld [vmem:[%s2769_s5 + $0x48] sm:$0xff] }
 0x1f2   :  { %v653_v55 = vpop.permute.xlu1 %652  ;;  %1054 = vmatmul.mubr.f32.gmra.mrb[10].mxu1 %v890_v5  ;;  %v1904_v51 = vpack.c.bf16 %v1324_v53, %v1323_v50  ;;  %v1326_v50 = vld [vmem:[%s2769_s5 + $0x58] sm:$0xff]  ;;  %v1343_v53 = vld [vmem:[%s2769_s5 + $0xe0] sm:$0xff] }
 0x1f3   :  { %674 = vst.msk [vmem:[#allocation3 + $0x90] sm:$0xff] %vm667_vm5, %v653_v55 }
 0x1f4   :  { %v834_v6 = vpop.permute.xlu0 %833  ;;  %1905 = vmatpush3.bf16.msra.mxu0 %v1904_v51  ;;  %v1344_v51 = vld [vmem:[%s2769_s5 + $0xe8] sm:$0xff] }
 0x1f5   :  { %854 = vst.msk [vmem:[#allocation3 + $0x98] sm:$0xff] %vm667_vm5, %v834_v6  ;;  %1907 = vmatprep.subr.bf16.mxu0 %v1906_v45 }
 0x1f6   :  { %v545_v54 = vpop.permute.xlu1 %544 }
 0x1f7   :  { %565 = vst.msk [vmem:[#allocation3 + $0xa8] sm:$0xff] %vm557_vm3, %v545_v54 }
 0x1f8   :  { %v784_v56 = vpop.permute.xlu0 %783 }
 0x1f9   :  { %802 = vst.msk [vmem:[#allocation3 + $0xc8] sm:$0xff] %vm612_vm4, %v784_v56 }
 0x1fa   :  { %v600_v8 = vpop.permute.xlu1 %599  ;;  %v893_v14 = vld [vmem:[#allocation3 + $0x90] sm:$0xff] }
 0x1fb   :  { %620 = vst.msk [vmem:[#allocation3 + $0xa8] sm:$0xff] %vm612_vm4, %v600_v8 }
 0x1fc   :  { %v894_v11 = vld [vmem:[#allocation3 + $0x98] sm:$0xff]  ;;  %v838_v12 = vpop.permute.xlu0 %837 }
 0x1fd   :  { %1058 = vmatprep.mubr.f32.mxu1 %v894_v11  ;;  %856 = vst.msk [vmem:[#allocation3 + $0xc8] sm:$0xff] %vm667_vm5, %v838_v12 }
 0x1fe   :  { %v655_v13 = vpop.permute.xlu1 %654  ;;  %1059 = vmatmul.mubr.f32.gmra.mrb[12].mxu1 %v893_v14 }
 0x1ff   :  { %675 = vst.msk [vmem:[#allocation3 + $0xa8] sm:$0xff] %vm667_vm5, %v655_v13  ;;  %1063 = vmatprep.mubr.f32.mxu1 %v897_v15 }
 0x202   :  { %v657_v17 = vpop.permute.xlu1 %656 }
 0x203   :  { %676 = vst.msk [vmem:[#allocation3 + $0xc0] sm:$0xff] %vm667_vm5, %v657_v17 }
 0x204   :  { %v900_v10 = vld [vmem:[#allocation3 + $0xc8] sm:$0xff] }
 0x206   :  { %v896_v19 = vld [vmem:[#allocation3 + $0xa8] sm:$0xff] }
 0x207   :  { %1064 = vmatmul.mubr.f32.gmra.mrb[14].mxu1 %v896_v19 }
 0x208   :  { %1068 = vmatprep.mubr.f32.mxu1 %v900_v10 }
 0x20a   :  { %v899_v20 = vld [vmem:[#allocation3 + $0xc0] sm:$0xff] }
 0x20b   :  { %1069 = vmatmul.mubr.f32.gmra.mrb[16].mxu1 %v899_v20 }
 0x20c   :  { %1806 = vmatprep.mubr.msk.f32.mxu1 %vm1961_vm6, %v1956_v40 }
 0x20f   :  { %1807 = vmatmul.mubr.msk.f32.vlgmr.msra.gmra.mrb[18].mxu1 %vm482_vm2, %v877_v7 }
 0x210   :  { %1809 = vmatprep.mubr.msk.f32.mxu1 %vm1961_vm6, %v1956_v40 }
 0x213   :  { %1810 = vmatmul.mubr.msk.f32.gmra.mrb[20].mxu1 %vm482_vm2, %v880_v47  ;;  %v1203_v47 = vlaneseq }
 0x214   :  { %1812 = vmatprep.mubr.msk.f32.mxu1 %vm1961_vm6, %v1956_v40 }
 0x217   :  { %1813 = vmatmul.mubr.msk.f32.gmra.mrb[22].mxu1 %vm482_vm2, %v883_v57 }
 0x218   :  { %1815 = vmatprep.mubr.msk.f32.mxu1 %vm1961_vm6, %v1956_v40 }
 0x21b   :  { %1816 = vmatmul.mubr.msk.f32.gmra.mrb[24].mxu1 %vm482_vm2, %v886_v44 }
 0x21c   :  { %1818 = vmatprep.mubr.msk.f32.mxu1 %vm1961_vm6, %v1956_v40 }
 0x21f   :  { %1819 = vmatmul.mubr.msk.f32.gmra.mrb[26].mxu1 %vm482_vm2, %v889_v58 }
 0x220   :  { %1821 = vmatprep.mubr.msk.f32.mxu1 %vm1961_vm6, %v1956_v40 }
 0x223   :  { %1822 = vmatmul.mubr.msk.f32.gmra.mrb[28].mxu1 %vm482_vm2, %v892_v59  ;;  %v1204_v59 = vshrl.u32 %v1203_v47, 7 }
 0x224   :  { %1824 = vmatprep.mubr.msk.f32.mxu1 %vm1961_vm6, %v1956_v40 }
 0x227   :  { %1825 = vmatmul.mubr.msk.f32.gmra.mrb[30].mxu1 %vm482_vm2, %v895_v60 }
 0x228   :  { %1827 = vmatprep.mubr.msk.f32.mxu1 %vm1961_vm6, %v1956_v40 }
 0x22b   :  { %1828 = vmatmul.mubr.msk.f32.gmra.mrb[32].mxu1 %vm482_vm2, %v898_v21 }
 0x22c   :  { %1830 = vmatprep.mubr.msk.f32.mxu1 %vm1961_vm6, %v1956_v40 }
 0x281   :  { %v1658_v22 = vpop.f32.mrb[0].mxu1 }
 0x282   :  { %v1659_v23 = vpop.f32.mrb[1].mxu1 }
 0x283   :  { %v2588_v24 = vadd.f32 %v1659_v23, %v1658_v22 }
 0x28d   :  { %v1661_v25 = vpop.f32.mrb[2].mxu1 }
 0x28e   :  { %v1662_v18 = vpop.f32.mrb[3].mxu1 }
 0x28f   :  { %v2590_v26 = vadd.f32 %v1662_v18, %v1661_v25  ;;  %v1205_v18 = vsub.s32 0, %v1204_v59 }
 0x291   :  { %v2666_v63 = vrot.slane %v2663_v49, %v1205_v18 }
 0x299   :  { %v1664_v1 = vpop.f32.mrb[4].mxu1 }
 0x29a   :  { %v1665_v4 = vpop.f32.mrb[5].mxu1 }
 0x29b   :  { %v1666_v43 = vadd.f32 %v1665_v4, %v1664_v1  ;;  %v2670_v1 = vsub.s32 %v1213_v31, %v1204_v59  ;;  %v1325_v4 = vld [vmem:[%s2769_s5 + $0x50] sm:$0xff] }
 0x2a5   :  { %v1667_v55 = vpop.f32.mrb[6].mxu1 }
 0x2a6   :  { %v1668_v5 = vpop.f32.mrb[7].mxu1  ;;  %v1908_v55 = vpack.c.bf16 %v1326_v50, %v1325_v4  ;;  %v1437_v50 = vld [vmem:[%s2771_s7 + $0x8] sm:$0xff] }
 0x2a7   :  { %v1910_v5 = vpack.c.bf16 %v1344_v51, %v1343_v53  ;;  %v1438_v53 = vld [vmem:[%s2771_s7 + $0x10] sm:$0xff] }
 0x2a8   :  { %1909 = vmatpush3.bf16.msra.mxu0 %v1908_v55  ;;  %v1439_v55 = vld [vmem:[%s2771_s7 + $0x18] sm:$0xff] }
 0x2a9   :  { %1911 = vmatprep.subr.bf16.mxu0 %v1910_v5  ;;  %v865_v5 = vld [vmem:[#allocation2 + $0x4e] sm:$0xff] }
 0x2aa   :  { %874 = vst.msk [vmem:[#allocation3 + $0xd0] sm:$0xff] %vm482_vm2, %v865_v5 }
 0x2b1   :  { %v1670_v6 = vpop.f32.mrb[8].mxu1 }
 0x2b2   :  { %v1671_v54 = vpop.f32.mrb[9].mxu1 }
 0x2b3   :  { %v1672_v56 = vadd.f32 %v1671_v54, %v1670_v6  ;;  %v1327_v6 = vld [vmem:[%s2769_s5 + $0x60] sm:$0xff]  ;;  %v1328_v54 = vld [vmem:[%s2769_s5 + $0x68] sm:$0xff] }
 0x2c5   :  { %v1673_v8 = vpop.f32.mrb[10].mxu1 }
 0x2c6   :  { %v1674_v11 = vpop.f32.mrb[11].mxu1 }
 0x2c7   :  { %v2652_v12 = vadd.f32 %v1674_v11, %v1673_v8 }
 0x2d1   :  { %v1676_v13 = vpop.f32.mrb[12].mxu1 }
 0x2d2   :  { %v1677_v14 = vpop.f32.mrb[13].mxu1 }
 0x2d3   :  { %v2654_v15 = vadd.f32 %v1677_v14, %v1676_v13  ;;  %v1912_v13 = vpack.c.bf16 %v1328_v54, %v1327_v6  ;;  %v901_v6 = vld [vmem:[#allocation3 + $0xd0] sm:$0xff] }
 0x2d4   :  { %1831 = vmatmul.mubr.msk.f32.gmra.mrb[34].mxu1 %vm482_vm2, %v901_v6 }
 0x2d5   :  { %1913 = vmatpush3.bf16.msra.mxu0 %v1912_v13 }
 0x2da   :  { %v1679_v17 = vpop.f32.mrb[14].mxu1 }
 0x2db   :  { %v1680_v10 = vpop.f32.mrb[15].mxu1 }
 0x2dc   :  { %v2656_v19 = vadd.f32 %v1680_v10, %v1679_v17 }
 0x2de   :  { %v1682_v20 = vpop.f32.mrb[16].mxu1 }
 0x2df   :  { %v1683_v7 = vpop.f32.mrb[17].mxu1 }
 0x2e2   :  { %v1139_v57 = vpop.f32.mrb[18].mxu1 }
 0x2e3   :  { %v1140_v44 = vadd.f32 %v2588_v24, %v1139_v57  ;;  %v1808_v58 = vpop.f32.mrb[19].mxu1 }
 0x2e5   :  { %v1183_v60 = vrot.slane %v1140_v44, 1 }
 0x2e6   :  { %v1144_v21 = vpop.f32.mrb[20].mxu1 }
 0x2e7   :  { %v1185_v22 = vmax.f32 %v1140_v44, %v1183_v60  ;;  %v1145_v23 = vadd.f32 %v2590_v26, %v1144_v21  ;;  %v1811_v25 = vpop.f32.mrb[21].mxu1 }
 0x2e9   :  { %v1187_v27 = vrot.slane %v1185_v22, 6  ;;  %v1195_v28 = vrot.slane %v1145_v23, 1 }
 0x2ea   :  { %v1149_v30 = vpop.f32.mrb[22].mxu1 }
 0x2eb   :  { %v1189_v24 = vmax.f32 %v1185_v22, %v1187_v27  ;;  %v1197_v61 = vmax.f32 %v1145_v23, %v1195_v28  ;;  %v1150_v46 = vadd.f32 %v1666_v43, %v1149_v30  ;;  %v1814_v62 = vpop.f32.mrb[23].mxu1 }
 0x2ed   :  { %v1199_v26 = vrot.slane %v1197_v61, 6  ;;  %v1225_v0 = vrot.slane %v1150_v46, 1  ;;  %v1190_v32 = vadd.f32 %v1189_v24, %v2663_v49 }
 0x2ee   :  { %v1154_v16 = vpop.f32.mrb[24].mxu1 }
 0x2ef   :  { %v1201_v34 = vmax.f32 %v1185_v22, %v1199_v26  ;;  %v1227_v35 = vmax.f32 %v1150_v46, %v1225_v0  ;;  %v1817_v36 = vpop.f32.mrb[25].mxu1  ;;  %v1191_v37 = vmax.f32 %v1190_v32, 0.0  ;;  %v1345_v26 = vld [vmem:[%s2769_s5 + $0xf0] sm:$0xff]  ;;  %v1346_v0 = vld [vmem:[%s2769_s5 + $0xf8] sm:$0xff] }
 0x2f1   :  { %v1229_v38 = vrot.slane %v1227_v35, 6  ;;  %v1208_v39 = vadd.f32 %v2666_v63, %v1201_v34  ;;  %1193 = vst.msk [vmem:[#allocation4] sm:$0x1] %vm1192_vm7, %v1191_v37  ;;  %v1914_v34 = vpack.c.bf16 %v1346_v0, %v1345_v26  ;;  %v1330_v35 = vld [vmem:[%s2769_s5 + $0x78] sm:$0xff] }
 0x2f2   :  { %v1158_v48 = vpop.f32.mrb[26].mxu1 }
 0x2f3   :  { %v1231_v41 = vmax.f32 %v1197_v61, %v1229_v38  ;;  %v1159_v42 = vadd.f32 %v1672_v56, %v1158_v48  ;;  %v1820_v43 = vpop.f32.mrb[27].mxu1  ;;  %v1209_v33 = vmax.f32 %v1208_v39, 0.0  ;;  %1915 = vmatprep.subr.bf16.mxu0 %v1914_v34 }
 0x2f5   :  { %v1232_v56 = vadd.f32 %v1231_v41, %v2666_v63  ;;  %v1217_v8 = vrot.slane %v1209_v33, %v2670_v1  ;;  %v1251_v7 = vrot.slane %v1159_v42, 1 }
 0x2f6   :  { %v1163_v11 = vpop.f32.mrb[28].mxu1 }
 0x2f7   :  { %v1233_v14 = vmax.f32 %v1232_v56, 0.0  ;;  %v1164_v17 = vadd.f32 %v2652_v12, %v1163_v11  ;;  %v1823_v10 = vpop.f32.mrb[29].mxu1  ;;  %v1218_v20 = vcombine.high %v1217_v8, %v1217_v8  ;;  %v1253_v22 = vmax.f32 %v1159_v42, %v1251_v7  ;;  %v1583_v56 = vld [vmem:[%s2770_s6] ss:$0 sm:$0xff]  ;;  %s1932_s6 = scalar_lea.vmem %s1529_s28, 32 }
 0x2f8   :  { %p1933_p0 = scmp.ne.s32.totalorder %s1529_s28, %s1932_s6  ;;  %p1938_p2 = scmp.lt.s32.totalorder %s1932_s6, %s1932_s6 }
 0x2f9   :  { %v1255_v47 = vrot.slane %v1164_v17, 1  ;;  %1219 = vrot.lane.b32.xlu0 %v1218_v20, %s1958_s25  ;;  %v1235_v57 = vcombine.high %v1233_v14, %v1233_v14 }
 0x2fa   :  { %v1168_v44 = vpop.f32.mrb[30].mxu1  ;;  %p1939_p3 = por %p1938_p2, %p1937_p1 }
 0x2fb   :  { %v1257_v58 = vmax.f32 %v1164_v17, %v1255_v47  ;;  %v1169_v59 = vadd.f32 %v2654_v15, %v1168_v44  ;;  %v1826_v60 = vpop.f32.mrb[31].mxu1  ;;  %v1242_v21 = vrot.slane %v1235_v57, %v2670_v1 }
 0x2fc   :  { %p1940_p4 = pnand %p1939_p3, %p1933_p0 }
 0x2fd   :  { %v1259_v23 = vrot.slane %v1257_v58, 6  ;;  %v1281_v25 = vrot.slane %v1169_v59, 1  ;;  %v1245_v12 = vcombine.high %v1242_v21, %v1242_v21  ;;  %1244 = vst.msk [vmem:[#allocation4 + $0x2] sm:$0x1] %vm1192_vm7, %v1242_v21 }
 0x2fe   :  { %v1173_v18 = vpop.f32.mrb[32].mxu1 }
 0x2ff   :  { %v1261_v27 = vmax.f32 %v1253_v22, %v1259_v23  ;;  %v1283_v28 = vmax.f32 %v1169_v59, %v1281_v25  ;;  %v1174_v29 = vadd.f32 %v2656_v19, %v1173_v18  ;;  %1246 = vrot.lane.b32.xlu1 %v1245_v12, %s1958_s25  ;;  %v1829_v9 = vpop.f32.mrb[33].mxu1  ;;  %v1329_v19 = vld [vmem:[%s2769_s5 + $0x70] sm:$0xff] }
 0x300   :  { %v1916_v36 = vpack.c.bf16 %v1330_v35, %v1329_v19 }
 0x301   :  { %v1262_v30 = vadd.f32 %v1261_v27, %v2666_v63  ;;  %v1285_v15 = vrot.slane %v1283_v28, 6  ;;  %v1292_v24 = vrot.slane %v1174_v29, 1 }
 0x302   :  { %1917 = vmatpush3.bf16.msra.mxu0 %v1916_v36 }
 0x303   :  { %v1263_v61 = vmax.f32 %v1262_v30, 0.0  ;;  %v1287_v46 = vmax.f32 %v1283_v28, %v1285_v15  ;;  %v1294_v62 = vmax.f32 %v1174_v29, %v1292_v24  ;;  %1918 = vmatprep.subr.bf16.mxu0 %v1960_v52 }
 0x305   :  { %v1296_v31 = vrot.slane %v1294_v62, 6  ;;  %v1265_v32 = vcombine.high %v1263_v61, %v1263_v61  ;;  %v1288_v16 = vadd.f32 %v1287_v46, %v2663_v49 }
 0x307   :  { %v1298_v37 = vmax.f32 %v1283_v28, %v1296_v31  ;;  %v1272_v38 = vrot.slane %v1265_v32, %v2670_v1  ;;  %v1289_v39 = vmax.f32 %v1288_v16, 0.0 }
 0x309   :  { %v1275_v48 = vcombine.high %v1272_v38, %v1272_v38  ;;  %v1299_v2 = vadd.f32 %v1298_v37, %v2666_v63  ;;  %1274 = vst.msk [vmem:[#allocation4 + $0x1] sm:$0x1] %vm1192_vm7, %v1272_v38  ;;  %1290 = vst.msk [vmem:[#allocation4 + $0x3] sm:$0x1] %vm1192_vm7, %v1289_v39 }
 0x30b   :  { %1276 = vrot.lane.b32.xlu0 %v1275_v48, %s1958_s25  ;;  %v1300_v49 = vmax.f32 %v1299_v2, 0.0 }
 0x30d   :  { %v1308_v3 = vrot.slane %v1300_v49, %v2670_v1  ;;  %v1436_v1 = vld [vmem:[%s2771_s7] sm:$0xff] }
 0x30e   :  { %v1919_v51 = vpack.c.bf16 %v1437_v50, %v1436_v1 }
 0x30f   :  { %v1309_v4 = vcombine.high %v1308_v3, %v1308_v3 }
 0x311   :  { %1310 = vrot.lane.b32.xlu1 %v1309_v4, %s1958_s25 }
 0x36b   :  { %v1220_v41 = vpop.permute.xlu0 %1219 }
 0x36c   :  { %1223 = vst.msk [vmem:[#allocation4] sm:$0x1] %vm1222_vm8, %v1220_v41 }
 0x371   :  { %v1247_v42 = vpop.permute.xlu1 %1246 }
 0x372   :  { %1249 = vst.msk [vmem:[#allocation4 + $0x2] sm:$0x1] %vm1222_vm8, %v1247_v42 }
 0x37d   :  { %v1277_v63 = vpop.permute.xlu0 %1276 }
 0x37e   :  { %1279 = vst.msk [vmem:[#allocation4 + $0x1] sm:$0x1] %vm1222_vm8, %v1277_v63 }
 0x383   :  { %v1311_v43 = vpop.permute.xlu1 %1310 }
 0x384   :  { %1313 = vst.msk [vmem:[#allocation4 + $0x3] sm:$0x1] %vm1222_vm8, %v1311_v43 }
 0x38b   :  { %v1584_v33 = vld.sshfl [vmem:[#allocation4] sm:$0x33 pattern:$0x76325410] }
 0x38c   :  { %v1362_v45 = vcombine.high %v1584_v33, %v1584_v33 }
 0x38e   :  { %1429 = vmatprep.mubr.f32.mxu0 %v1362_v45 }
 0x38f   :  { %1430 = vmatmul.mubr.f32.vlgmr.msra.gmra.mrb[36].mxu0 %v1584_v33 }
 0x390   :  { %1841 = vmatprep.mubr.msk.f32.mxu0 %vm1961_vm6, %v1956_v40  ;;  %1920 = vmatpush3.bf16.msra.mxu0 %v1919_v51  ;;  %v1922_v40 = vpack.c.bf16 %v1439_v55, %v1438_v53 }
 0x391   :  { %1921 = vmatprep.subr.bf16.mxu0 %v1960_v52  ;;  %v1585_v52 = vld [vmem:[%s2772_s8] ss:$0 sm:$0xff] }
 0x394   :  { %1923 = vmatpush3.bf16.msra.mxu0 %v1922_v40 }
 0x3a7   :  { %v1178_v17 = vpop.f32.mrb[34].mxu1 }
 0x3a8   :  { %v1832_v10 = vpop.f32.mrb[35].mxu1 }
 0x462   :  { %v1730_v54 = vpop.f32.mrb[36].mxu0 }
 0x463   :  { %v1731_v8 = vpop.f32.mrb[37].mxu0 }
 0x464   :  { %v1732_v11 = vadd.f32 %v1731_v8, %v1730_v54 }
 0x466   :  { %v1432_v13 = vadd.f32 %v1732_v11, %v1583_v56 }
 0x468   :  { %v1435_v14 = vmax.f32 %v1432_v13, 0.0 }
 0x46a   :  { %1842 = vmatmul.mubr.msk.f32.vlgmr.msra.gmra.mrb[38].mxu0 %vm482_vm2, %v1435_v14 }
 0x53d   :  { %v1516_v20 = vpop.f32.mrb[38].mxu0 }
 0x53e   :  { %v1517_v7 = vadd.f32 %v1585_v52, %v1516_v20  ;;  %v1843_v47 = vpop.f32.mrb[39].mxu0 }
 0x540   :  { %1521 = vst.msk [vmem:[#allocation5] sm:$0x3] %vm1520_vm9, %v1517_v7 }
 0x541   :  { %1943 = shalt.err (!%p1940_p4)
}
 0x542   :  { %s1944_s10 = scalar_lea.hbm %s2773_s9, 32 }
 0x543   :  { %p1945_p5 = scmp.ne.s32.totalorder %s2773_s9, %s1944_s10  ;;  %p1948_p6 = scmp.lt.u32.totalorder %s1944_s10, %s2773_s9 }
 0x545   :  { %p1950_p7 = pnand %p1948_p6, %p1945_p5 }
 0x547   :  { %1953 = shalt.err (!%p1950_p7)
}
 0x548   :  { %1531 = dma.vmem_to_hbm [thread:$0]  %s1529_s28, 32, %s2773_s9, [#allocation6]  }
 0x549   :  { %1954 = dma.done.wait [#allocation6], 32  }
 0x54a   :  { %1955 = vsyncadd [#allocation6], 4294967264 }
 0x54b   :  { %1535 = vsyncpa [#allocation6], 1 }

</bundles_post_ra>
